<compile_context>
chip_gen: v6e
topology: v6e:2x2x1
jax: 0.10.0
libtpu: 0.0.40
codegen_flags: <defaults>
</compile_context>

<pallas_src>
import numpy as np

import jax
import jax.numpy as jnp
from jax import lax
from jax.experimental import pallas as pl
from jax.experimental.pallas import tpu as pltpu


def _tap_geometry(H, W):
    """Static (shift, lo, hi) per 3x3 tap on the flat (H*W) spatial axis."""
    HW = H * W
    geom = []
    for ky in range(3):
        for kx in range(3):
            dy, dx = ky - 1, kx - 1
            s = dy * W + dx              # flat source offset of this tap
            lo = max(0, -s)              # output columns [lo, hi) have an in-range source
            hi = HW - max(0, s)
            geom.append((s, lo, hi))
    return geom


def _tap_masks(H, W):
    """(9, H*W) float32 0/1 validity masks (0 where the tap lands in the zero padding)."""
    HW = H * W
    yy, xx = np.meshgrid(np.arange(H), np.arange(W), indexing="ij")
    masks = np.zeros((9, HW), np.float32)
    for ky in range(3):
        for kx in range(3):
            dy, dx = ky - 1, kx - 1
            valid = ((yy + dy >= 0) & (yy + dy < H) &
                     (xx + dx >= 0) & (xx + dx < W))
            masks[ky * 3 + kx] = valid.reshape(-1).astype(np.float32)
    return masks


def _make_double_conv_kernel(H, W):
    HW = H * W
    geom = _tap_geometry(H, W)

    def kernel(x_ref, w1_ref, s1_ref, b1_ref, w2_ref, s2_ref, b2_ref, mask_ref,
               o_ref, p1_ref, p2_ref, h1_ref):
        # x_ref   : (NB, Cin, HW)   activations, spatial flat on lanes
        # w1_ref  : (Cmid, 9*Cin)   im2col-packed weights (bf16 or f32)
        # w2_ref  : (Cout, 9*Cmid)
        # s*/b*   : (C, 1)          folded BN scale / shift (f32)
        # mask_ref: (9, HW)         per-tap 0/1 padding masks (f32)
        # o_ref   : (NB, Cout, HW)
        # p1/p2   : im2col operands (f32 scratch); h1_ref: BN1+ReLU intermediate
        nb = x_ref.shape[0]
        c_in = x_ref.shape[1]
        c_mid = w1_ref.shape[0]
        c_out = o_ref.shape[1]
        mxu_dtype = w1_ref.dtype

        def zero_halo_strips(p_ref, c):
            # Columns with no in-range source pixel encode the conv's zero padding.
            # They are never touched by im2col below, so zero only these small strips
            # once per kernel invocation (never the whole buffer).
            for t, (s, lo, hi) in enumerate(geom):
                if lo > 0:
                    p_ref[t * c:(t + 1) * c, 0:lo] = jnp.zeros((c, lo), p_ref.dtype)
                if hi < HW:
                    p_ref[t * c:(t + 1) * c, hi:HW] = jnp.zeros((c, HW - hi), p_ref.dtype)

        def im2col(load, p_ref, c):
            # Stack the 9 shifted+masked activation copies along K:
            #   p[t*c + i, f] = act[i, f + s_t] * mask_t[f]
            for t, (s, lo, hi) in enumerate(geom):
                piece = load(lo + s, hi + s)                     # (c, hi - lo)
                if s != 0:                                       # center tap mask == 1
                    piece = piece * mask_ref[t:t + 1, lo:hi]
                p_ref[t * c:(t + 1) * c, lo:hi] = piece.astype(p_ref.dtype)

        zero_halo_strips(p1_ref, c_in)
        zero_halo_strips(p2_ref, c_mid)

        for b in range(nb):
            # ---- conv1 (3x3, pad 1): one (Cmid, 9*Cin) x (9*Cin, HW) matmul ----
            im2col(lambda a, z: x_ref[b, :, a:z], p1_ref, c_in)
            h1 = jnp.dot(w1_ref[...], p1_ref[...].astype(mxu_dtype),
                         preferred_element_type=jnp.float32)      # (Cmid, HW) f32
            # BN1 (folded) + ReLU, f32 epilogue
            h1 = jnp.maximum(h1 * s1_ref[...] + b1_ref[...], 0.0)
            h1_ref[...] = h1

            # ---- conv2 (3x3, pad 1): one (Cout, 9*Cmid) x (9*Cmid, HW) matmul ----
            im2col(lambda a, z: h1_ref[:, a:z], p2_ref, c_mid)
            h2 = jnp.dot(w2_ref[...], p2_ref[...].astype(mxu_dtype),
                         preferred_element_type=jnp.float32)      # (Cout, HW) f32
            # BN2 (folded), no ReLU (matches the module)
            o_ref[b] = (h2 * s2_ref[...] + b2_ref[...]).astype(o_ref.dtype)

    return kernel


def double_conv(x_nchw, params, *, eps=1e-5, compute_dtype=jnp.bfloat16,
                images_per_step=1):
    """Fused DoubleConv forward.  x_nchw: (N, Cin, H, W) f32 -> (N, Cout, H, W) f32.

    compute_dtype:    dtype of the MXU inputs (activations / weights); accumulation
                      and the BN/ReLU epilogue are always f32.  Use jnp.float32 for
                      bit-faithful results vs. an f32 reference.
    images_per_step:  batch elements per grid step (amortizes per-step overhead);
                      must divide N, otherwise falls back to 1.
    """
    w1, g1, be1, m1, v1, w2, g2, be2, m2, v2 = params
    N, c_in, H, W = x_nchw.shape
    c_mid, c_out = w1.shape[0], w2.shape[0]
    HW = H * W

    # Fold BatchNorm (running stats) into per-channel scale & shift (f32).
    inv1 = (g1 / jnp.sqrt(v1 + eps)).astype(jnp.float32)
    inv2 = (g2 / jnp.sqrt(v2 + eps)).astype(jnp.float32)
    s1 = inv1.reshape(c_mid, 1)
    b1 = (be1 - m1 * inv1).reshape(c_mid, 1).astype(jnp.float32)
    s2 = inv2.reshape(c_out, 1)
    b2 = (be2 - m2 * inv2).reshape(c_out, 1).astype(jnp.float32)

    # PyTorch OIHW -> (O, 9*I); column index = (ky*3 + kx)*I + i (matches im2col rows).
    w1m = jnp.transpose(w1, (0, 2, 3, 1)).reshape(c_mid, 9 * c_in).astype(compute_dtype)
    w2m = jnp.transpose(w2, (0, 2, 3, 1)).reshape(c_out, 9 * c_mid).astype(compute_dtype)

    # NCHW -> (N, C, H*W): a free reshape (no transpose, no padding pass).
    x_flat = x_nchw.reshape(N, c_in, HW).astype(compute_dtype)

    masks = jnp.asarray(_tap_masks(H, W))            # (9, HW) f32 constants

    nb = images_per_step if (images_per_step > 0 and N % images_per_step == 0) else 1
    grid = (N // nb,)

    out_flat = pl.pallas_call(
        _make_double_conv_kernel(H, W),
        out_shape=jax.ShapeDtypeStruct((N, c_out, HW), jnp.float32),
        grid_spec=pltpu.PrefetchScalarGridSpec(
            num_scalar_prefetch=0,
            grid=grid,
            in_specs=[
                pl.BlockSpec((nb, c_in, HW), lambda n: (n, 0, 0)),
                pl.BlockSpec((c_mid, 9 * c_in), lambda n: (0, 0)),
                pl.BlockSpec((c_mid, 1), lambda n: (0, 0)),
                pl.BlockSpec((c_mid, 1), lambda n: (0, 0)),
                pl.BlockSpec((c_out, 9 * c_mid), lambda n: (0, 0)),
                pl.BlockSpec((c_out, 1), lambda n: (0, 0)),
                pl.BlockSpec((c_out, 1), lambda n: (0, 0)),
                pl.BlockSpec((9, HW), lambda n: (0, 0)),
            ],
            out_specs=pl.BlockSpec((nb, c_out, HW), lambda n: (n, 0, 0)),
            scratch_shapes=[
                pltpu.VMEM((9 * c_in, HW), jnp.float32),    # im2col operand, conv1
                pltpu.VMEM((9 * c_mid, HW), jnp.float32),   # im2col operand, conv2
                pltpu.VMEM((c_mid, HW), jnp.float32),       # BN1+ReLU intermediate
            ],
        ),
        compiler_params=pltpu.CompilerParams(
            dimension_semantics=("parallel",),
        ),
    )(x_flat, w1m, s1, b1, w2m, s2, b2, masks)

    # (N, Cout, H*W) -> NCHW: again a free reshape.
    return out_flat.reshape(N, c_out, H, W)


def ref_double_conv(x, params, *, eps=1e-5, compute_dtype=jnp.float32):
    """Pure-JAX reference (lax.conv).  compute_dtype mirrors the kernel's MXU dtype."""
    w1, g1, be1, m1, v1, w2, g2, be2, m2, v2 = params
    dn = ("NCHW", "OIHW", "NCHW")

    def bn(y, g, b, m, v):
        inv = (g / jnp.sqrt(v + eps))[None, :, None, None]
        return (y - m[None, :, None, None]) * inv + b[None, :, None, None]

    y = lax.conv_general_dilated(
        x.astype(compute_dtype), w1.astype(compute_dtype), (1, 1), "SAME",
        dimension_numbers=dn, preferred_element_type=jnp.float32)
    y = jnp.maximum(bn(y, g1, be1, m1, v1), 0.0)
    y = lax.conv_general_dilated(
        y.astype(compute_dtype), w2.astype(compute_dtype), (1, 1), "SAME",
        dimension_numbers=dn, preferred_element_type=jnp.float32)
    return bn(y, g2, be2, m2, v2)


if __name__ == "__main__":
    # DoubleConv(in_channels=4, out_channels=8) -> mid_channels = 8
    N, c_in, c_mid, c_out, H, W = 2, 4, 8, 8, 16, 16

    key = jax.random.PRNGKey(0)
    ks = jax.random.split(key, 11)

    x = jax.random.normal(ks[0], (N, c_in, H, W), jnp.float32)

    w1 = 0.1 * jax.random.normal(ks[1], (c_mid, c_in, 3, 3), jnp.float32)
    g1 = 1.0 + 0.1 * jax.random.normal(ks[2], (c_mid,), jnp.float32)
    be1 = 0.1 * jax.random.normal(ks[3], (c_mid,), jnp.float32)
    m1 = 0.1 * jax.random.normal(ks[4], (c_mid,), jnp.float32)
    v1 = 0.5 + jnp.abs(jax.random.normal(ks[5], (c_mid,), jnp.float32))

    w2 = 0.1 * jax.random.normal(ks[6], (c_out, c_mid, 3, 3), jnp.float32)
    g2 = 1.0 + 0.1 * jax.random.normal(ks[7], (c_out,), jnp.float32)
    be2 = 0.1 * jax.random.normal(ks[8], (c_out,), jnp.float32)
    m2 = 0.1 * jax.random.normal(ks[9], (c_out,), jnp.float32)
    v2 = 0.5 + jnp.abs(jax.random.normal(ks[10], (c_out,), jnp.float32))

    params = (w1, g1, be1, m1, v1, w2, g2, be2, m2, v2)

    # --- f32 MXU path, one image per grid step: strict semantics check ---
    out_f32 = jax.block_until_ready(
        double_conv(x, params, compute_dtype=jnp.float32, images_per_step=1))
    ref_f32 = jax.block_until_ready(
        ref_double_conv(x, params, compute_dtype=jnp.float32))
    assert out_f32.shape == (N, c_out, H, W), out_f32.shape
    err_f32 = float(jnp.max(jnp.abs(out_f32 - ref_f32)))
    assert jnp.allclose(out_f32, ref_f32, atol=2e-4, rtol=2e-4), \
        f"f32 path max abs err = {err_f32}"

    # --- bf16 MXU path (default), two images per grid step (batch-blocked) ---
    out_bf16 = jax.block_until_ready(
        double_conv(x, params, compute_dtype=jnp.bfloat16, images_per_step=2))
    ref_bf16 = jax.block_until_ready(
        ref_double_conv(x, params, compute_dtype=jnp.bfloat16))
    err_bf16 = float(jnp.max(jnp.abs(out_bf16 - ref_bf16)))
    assert jnp.allclose(out_bf16, ref_bf16, atol=2e-3, rtol=2e-3), \
        f"bf16 path max abs err = {err_bf16}"

    print("KERNEL_OK")
</pallas_src>

<mosaic_0001>
module attributes {stable_mosaic.version = 11 : i64} {
  func.func @kernel(%arg0: i32, %arg1: memref<1x4x256xf32, #tpu.memory_space<vmem>>, %arg2: memref<8x36xf32, #tpu.memory_space<vmem>>, %arg3: memref<8x1xf32, #tpu.memory_space<vmem>>, %arg4: memref<8x1xf32, #tpu.memory_space<vmem>>, %arg5: memref<8x72xf32, #tpu.memory_space<vmem>>, %arg6: memref<8x1xf32, #tpu.memory_space<vmem>>, %arg7: memref<8x1xf32, #tpu.memory_space<vmem>>, %arg8: memref<9x256xf32, #tpu.memory_space<vmem>>, %arg9: memref<1x8x256xf32, #tpu.memory_space<vmem>>, %arg10: memref<36x256xf32, #tpu.memory_space<vmem>>, %arg11: memref<72x256xf32, #tpu.memory_space<vmem>>, %arg12: memref<8x256xf32, #tpu.memory_space<vmem>>) attributes {dimension_semantics = [#tpu.dimension_semantics<parallel>], iteration_bounds = array<i64: 2>, scalar_prefetch = 0 : i64, scratch_operands = 3 : i64, tpu.core_type = #tpu.core_type<tc>, window_params = [{transform_indices = @transform_0, window_bounds = array<i64: 1, 4, 256>}, {pipeline_mode = #tpu.pipeline_mode<synchronous>, transform_indices = @transform_1, window_bounds = array<i64: 8, 36>}, {pipeline_mode = #tpu.pipeline_mode<synchronous>, transform_indices = @transform_2, window_bounds = array<i64: 8, 1>}, {pipeline_mode = #tpu.pipeline_mode<synchronous>, transform_indices = @transform_3, window_bounds = array<i64: 8, 1>}, {pipeline_mode = #tpu.pipeline_mode<synchronous>, transform_indices = @transform_4, window_bounds = array<i64: 8, 72>}, {pipeline_mode = #tpu.pipeline_mode<synchronous>, transform_indices = @transform_5, window_bounds = array<i64: 8, 1>}, {pipeline_mode = #tpu.pipeline_mode<synchronous>, transform_indices = @transform_6, window_bounds = array<i64: 8, 1>}, {pipeline_mode = #tpu.pipeline_mode<synchronous>, transform_indices = @transform_7, window_bounds = array<i64: 9, 256>}, {transform_indices = @transform_8, window_bounds = array<i64: 1, 8, 256>}]} {
    %cst = arith.constant 0.000000e+00 : f32
    %0 = vector.broadcast %cst : f32 to vector<4x17xf32>
    %c0 = arith.constant 0 : index
    %c0_0 = arith.constant 0 : index
    %1 = vector.load %arg10[%c0, %c0_0] : memref<36x256xf32, #tpu.memory_space<vmem>>, vector<4x17xf32>
    tpu.vector_store %arg10[%c0, %c0_0], %0 {strides = array<i32>} : memref<36x256xf32, #tpu.memory_space<vmem>>, vector<4x17xf32>,
    %cst_1 = arith.constant 0.000000e+00 : f32
    %2 = vector.broadcast %cst_1 : f32 to vector<4x16xf32>
    %c4 = arith.constant 4 : index
    %c0_2 = arith.constant 0 : index
    %3 = vector.load %arg10[%c4, %c0_2] : memref<36x256xf32, #tpu.memory_space<vmem>>, vector<4x16xf32>
    tpu.vector_store %arg10[%c4, %c0_2], %2 {strides = array<i32>} : memref<36x256xf32, #tpu.memory_space<vmem>>, vector<4x16xf32>,
    %cst_3 = arith.constant 0.000000e+00 : f32
    %4 = vector.broadcast %cst_3 : f32 to vector<4x15xf32>
    %c8 = arith.constant 8 : index
    %c0_4 = arith.constant 0 : index
    %5 = vector.load %arg10[%c8, %c0_4] : memref<36x256xf32, #tpu.memory_space<vmem>>, vector<4x15xf32>
    tpu.vector_store %arg10[%c8, %c0_4], %4 {strides = array<i32>} : memref<36x256xf32, #tpu.memory_space<vmem>>, vector<4x15xf32>,
    %cst_5 = arith.constant 0.000000e+00 : f32
    %6 = vector.broadcast %cst_5 : f32 to vector<4x1xf32>
    %c12 = arith.constant 12 : index
    %c0_6 = arith.constant 0 : index
    %7 = vector.load %arg10[%c12, %c0_6] : memref<36x256xf32, #tpu.memory_space<vmem>>, vector<4x1xf32>
    tpu.vector_store %arg10[%c12, %c0_6], %6 {strides = array<i32>} : memref<36x256xf32, #tpu.memory_space<vmem>>, vector<4x1xf32>,
    %cst_7 = arith.constant 0.000000e+00 : f32
    %8 = vector.broadcast %cst_7 : f32 to vector<4x1xf32>
    %c20 = arith.constant 20 : index
    %c255 = arith.constant 255 : index
    %9 = vector.load %arg10[%c20, %c255] : memref<36x256xf32, #tpu.memory_space<vmem>>, vector<4x1xf32>
    tpu.vector_store %arg10[%c20, %c255], %8 {strides = array<i32>} : memref<36x256xf32, #tpu.memory_space<vmem>>, vector<4x1xf32>,
    %cst_8 = arith.constant 0.000000e+00 : f32
    %10 = vector.broadcast %cst_8 : f32 to vector<4x15xf32>
    %c24 = arith.constant 24 : index
    %c241 = arith.constant 241 : index
    %11 = vector.load %arg10[%c24, %c241] : memref<36x256xf32, #tpu.memory_space<vmem>>, vector<4x15xf32>
    tpu.vector_store %arg10[%c24, %c241], %10 {strides = array<i32>} : memref<36x256xf32, #tpu.memory_space<vmem>>, vector<4x15xf32>,
    %cst_9 = arith.constant 0.000000e+00 : f32
    %12 = vector.broadcast %cst_9 : f32 to vector<4x16xf32>
    %c28 = arith.constant 28 : index
    %c240 = arith.constant 240 : index
    %13 = vector.load %arg10[%c28, %c240] : memref<36x256xf32, #tpu.memory_space<vmem>>, vector<4x16xf32>
    tpu.vector_store %arg10[%c28, %c240], %12 {strides = array<i32>} : memref<36x256xf32, #tpu.memory_space<vmem>>, vector<4x16xf32>,
    %cst_10 = arith.constant 0.000000e+00 : f32
    %14 = vector.broadcast %cst_10 : f32 to vector<4x17xf32>
    %c32 = arith.constant 32 : index
    %c239 = arith.constant 239 : index
    %15 = vector.load %arg10[%c32, %c239] : memref<36x256xf32, #tpu.memory_space<vmem>>, vector<4x17xf32>
    tpu.vector_store %arg10[%c32, %c239], %14 {strides = array<i32>} : memref<36x256xf32, #tpu.memory_space<vmem>>, vector<4x17xf32>,
    %cst_11 = arith.constant 0.000000e+00 : f32
    %16 = vector.broadcast %cst_11 : f32 to vector<8x17xf32>
    %c0_12 = arith.constant 0 : index
    %c0_13 = arith.constant 0 : index
    %17 = vector.load %arg11[%c0_12, %c0_13] : memref<72x256xf32, #tpu.memory_space<vmem>>, vector<8x17xf32>
    tpu.vector_store %arg11[%c0_12, %c0_13], %16 {strides = array<i32>} : memref<72x256xf32, #tpu.memory_space<vmem>>, vector<8x17xf32>,
    %cst_14 = arith.constant 0.000000e+00 : f32
    %18 = vector.broadcast %cst_14 : f32 to vector<8x16xf32>
    %c8_15 = arith.constant 8 : index
    %c0_16 = arith.constant 0 : index
    %19 = vector.load %arg11[%c8_15, %c0_16] : memref<72x256xf32, #tpu.memory_space<vmem>>, vector<8x16xf32>
    tpu.vector_store %arg11[%c8_15, %c0_16], %18 {strides = array<i32>} : memref<72x256xf32, #tpu.memory_space<vmem>>, vector<8x16xf32>,
    %cst_17 = arith.constant 0.000000e+00 : f32
    %20 = vector.broadcast %cst_17 : f32 to vector<8x15xf32>
    %c16 = arith.constant 16 : index
    %c0_18 = arith.constant 0 : index
    %21 = vector.load %arg11[%c16, %c0_18] : memref<72x256xf32, #tpu.memory_space<vmem>>, vector<8x15xf32>
    tpu.vector_store %arg11[%c16, %c0_18], %20 {strides = array<i32>} : memref<72x256xf32, #tpu.memory_space<vmem>>, vector<8x15xf32>,
    %cst_19 = arith.constant 0.000000e+00 : f32
    %22 = vector.broadcast %cst_19 : f32 to vector<8x1xf32>
    %c24_20 = arith.constant 24 : index
    %c0_21 = arith.constant 0 : index
    %23 = vector.load %arg11[%c24_20, %c0_21] : memref<72x256xf32, #tpu.memory_space<vmem>>, vector<8x1xf32>
    tpu.vector_store %arg11[%c24_20, %c0_21], %22 {strides = array<i32>} : memref<72x256xf32, #tpu.memory_space<vmem>>, vector<8x1xf32>,
    %cst_22 = arith.constant 0.000000e+00 : f32
    %24 = vector.broadcast %cst_22 : f32 to vector<8x1xf32>
    %c40 = arith.constant 40 : index
    %c255_23 = arith.constant 255 : index
    %25 = vector.load %arg11[%c40, %c255_23] : memref<72x256xf32, #tpu.memory_space<vmem>>, vector<8x1xf32>
    tpu.vector_store %arg11[%c40, %c255_23], %24 {strides = array<i32>} : memref<72x256xf32, #tpu.memory_space<vmem>>, vector<8x1xf32>,
    %cst_24 = arith.constant 0.000000e+00 : f32
    %26 = vector.broadcast %cst_24 : f32 to vector<8x15xf32>
    %c48 = arith.constant 48 : index
    %c241_25 = arith.constant 241 : index
    %27 = vector.load %arg11[%c48, %c241_25] : memref<72x256xf32, #tpu.memory_space<vmem>>, vector<8x15xf32>
    tpu.vector_store %arg11[%c48, %c241_25], %26 {strides = array<i32>} : memref<72x256xf32, #tpu.memory_space<vmem>>, vector<8x15xf32>,
    %cst_26 = arith.constant 0.000000e+00 : f32
    %28 = vector.broadcast %cst_26 : f32 to vector<8x16xf32>
    %c56 = arith.constant 56 : index
    %c240_27 = arith.constant 240 : index
    %29 = vector.load %arg11[%c56, %c240_27] : memref<72x256xf32, #tpu.memory_space<vmem>>, vector<8x16xf32>
    tpu.vector_store %arg11[%c56, %c240_27], %28 {strides = array<i32>} : memref<72x256xf32, #tpu.memory_space<vmem>>, vector<8x16xf32>,
    %cst_28 = arith.constant 0.000000e+00 : f32
    %30 = vector.broadcast %cst_28 : f32 to vector<8x17xf32>
    %c64 = arith.constant 64 : index
    %c239_29 = arith.constant 239 : index
    %31 = vector.load %arg11[%c64, %c239_29] : memref<72x256xf32, #tpu.memory_space<vmem>>, vector<8x17xf32>
    tpu.vector_store %arg11[%c64, %c239_29], %30 {strides = array<i32>} : memref<72x256xf32, #tpu.memory_space<vmem>>, vector<8x17xf32>,
    %c0_30 = arith.constant 0 : index
    %c0_31 = arith.constant 0 : index
    %c0_32 = arith.constant 0 : index
    %32 = vector.load %arg1[%c0_30, %c0_31, %c0_32] : memref<1x4x256xf32, #tpu.memory_space<vmem>>, vector<1x4x239xf32>
    %33 = vector.shape_cast %32 : vector<1x4x239xf32> to vector<4x239xf32>
    %c0_33 = arith.constant 0 : index
    %c17 = arith.constant 17 : index
    %34 = vector.load %arg8[%c0_33, %c17] : memref<9x256xf32, #tpu.memory_space<vmem>>, vector<1x239xf32>
    %35 = vector.broadcast %34 : vector<1x239xf32> to vector<4x239xf32>
    %36 = arith.mulf %33, %35 : vector<4x239xf32>
    %c0_34 = arith.constant 0 : index
    %c17_35 = arith.constant 17 : index
    %37 = vector.load %arg10[%c0_34, %c17_35] : memref<36x256xf32, #tpu.memory_space<vmem>>, vector<4x239xf32>
    tpu.vector_store %arg10[%c0_34, %c17_35], %36 {strides = array<i32>} : memref<36x256xf32, #tpu.memory_space<vmem>>, vector<4x239xf32>,
    %c0_36 = arith.constant 0 : index
    %c0_37 = arith.constant 0 : index
    %c0_38 = arith.constant 0 : index
    %38 = vector.load %arg1[%c0_36, %c0_37, %c0_38] : memref<1x4x256xf32, #tpu.memory_space<vmem>>, vector<1x4x240xf32>
    %39 = vector.shape_cast %38 : vector<1x4x240xf32> to vector<4x240xf32>
    %c1 = arith.constant 1 : index
    %c16_39 = arith.constant 16 : index
    %40 = vector.load %arg8[%c1, %c16_39] : memref<9x256xf32, #tpu.memory_space<vmem>>, vector<1x240xf32>
    %41 = vector.broadcast %40 : vector<1x240xf32> to vector<4x240xf32>
    %42 = arith.mulf %39, %41 : vector<4x240xf32>
    %c4_40 = arith.constant 4 : index
    %c16_41 = arith.constant 16 : index
    %43 = vector.load %arg10[%c4_40, %c16_41] : memref<36x256xf32, #tpu.memory_space<vmem>>, vector<4x240xf32>
    tpu.vector_store %arg10[%c4_40, %c16_41], %42 {strides = array<i32>} : memref<36x256xf32, #tpu.memory_space<vmem>>, vector<4x240xf32>,
    %c0_42 = arith.constant 0 : index
    %c0_43 = arith.constant 0 : index
    %c0_44 = arith.constant 0 : index
    %44 = vector.load %arg1[%c0_42, %c0_43, %c0_44] : memref<1x4x256xf32, #tpu.memory_space<vmem>>, vector<1x4x241xf32>
    %45 = vector.shape_cast %44 : vector<1x4x241xf32> to vector<4x241xf32>
    %c2 = arith.constant 2 : index
    %c15 = arith.constant 15 : index
    %46 = vector.load %arg8[%c2, %c15] : memref<9x256xf32, #tpu.memory_space<vmem>>, vector<1x241xf32>
    %47 = vector.broadcast %46 : vector<1x241xf32> to vector<4x241xf32>
    %48 = arith.mulf %45, %47 : vector<4x241xf32>
    %c8_45 = arith.constant 8 : index
    %c15_46 = arith.constant 15 : index
    %49 = vector.load %arg10[%c8_45, %c15_46] : memref<36x256xf32, #tpu.memory_space<vmem>>, vector<4x241xf32>
    tpu.vector_store %arg10[%c8_45, %c15_46], %48 {strides = array<i32>} : memref<36x256xf32, #tpu.memory_space<vmem>>, vector<4x241xf32>,
    %c0_47 = arith.constant 0 : index
    %c0_48 = arith.constant 0 : index
    %c0_49 = arith.constant 0 : index
    %50 = vector.load %arg1[%c0_47, %c0_48, %c0_49] : memref<1x4x256xf32, #tpu.memory_space<vmem>>, vector<1x4x255xf32>
    %51 = vector.shape_cast %50 : vector<1x4x255xf32> to vector<4x255xf32>
    %c3 = arith.constant 3 : index
    %c1_50 = arith.constant 1 : index
    %52 = vector.load %arg8[%c3, %c1_50] : memref<9x256xf32, #tpu.memory_space<vmem>>, vector<1x255xf32>
    %53 = vector.broadcast %52 : vector<1x255xf32> to vector<4x255xf32>
    %54 = arith.mulf %51, %53 : vector<4x255xf32>
    %c12_51 = arith.constant 12 : index
    %c1_52 = arith.constant 1 : index
    %55 = vector.load %arg10[%c12_51, %c1_52] : memref<36x256xf32, #tpu.memory_space<vmem>>, vector<4x255xf32>
    tpu.vector_store %arg10[%c12_51, %c1_52], %54 {strides = array<i32>} : memref<36x256xf32, #tpu.memory_space<vmem>>, vector<4x255xf32>,
    %c0_53 = arith.constant 0 : index
    %c0_54 = arith.constant 0 : index
    %c0_55 = arith.constant 0 : index
    %56 = vector.load %arg1[%c0_53, %c0_54, %c0_55] : memref<1x4x256xf32, #tpu.memory_space<vmem>>, vector<1x4x256xf32>
    %57 = vector.shape_cast %56 : vector<1x4x256xf32> to vector<4x256xf32>
    %c16_56 = arith.constant 16 : index
    %c0_57 = arith.constant 0 : index
    %58 = vector.load %arg10[%c16_56, %c0_57] : memref<36x256xf32, #tpu.memory_space<vmem>>, vector<4x256xf32>
    tpu.vector_store %arg10[%c16_56, %c0_57], %57 {strides = array<i32>} : memref<36x256xf32, #tpu.memory_space<vmem>>, vector<4x256xf32>,
    %c0_58 = arith.constant 0 : index
    %c0_59 = arith.constant 0 : index
    %c1_60 = arith.constant 1 : index
    %59 = vector.load %arg1[%c0_58, %c0_59, %c1_60] : memref<1x4x256xf32, #tpu.memory_space<vmem>>, vector<1x4x255xf32>
    %60 = vector.shape_cast %59 : vector<1x4x255xf32> to vector<4x255xf32>
    %c5 = arith.constant 5 : index
    %c0_61 = arith.constant 0 : index
    %61 = vector.load %arg8[%c5, %c0_61] : memref<9x256xf32, #tpu.memory_space<vmem>>, vector<1x255xf32>
    %62 = vector.broadcast %61 : vector<1x255xf32> to vector<4x255xf32>
    %63 = arith.mulf %60, %62 : vector<4x255xf32>
    %c20_62 = arith.constant 20 : index
    %c0_63 = arith.constant 0 : index
    %64 = vector.load %arg10[%c20_62, %c0_63] : memref<36x256xf32, #tpu.memory_space<vmem>>, vector<4x255xf32>
    tpu.vector_store %arg10[%c20_62, %c0_63], %63 {strides = array<i32>} : memref<36x256xf32, #tpu.memory_space<vmem>>, vector<4x255xf32>,
    %c0_64 = arith.constant 0 : index
    %c0_65 = arith.constant 0 : index
    %c15_66 = arith.constant 15 : index
    %65 = vector.load %arg1[%c0_64, %c0_65, %c15_66] : memref<1x4x256xf32, #tpu.memory_space<vmem>>, vector<1x4x241xf32>
    %66 = vector.shape_cast %65 : vector<1x4x241xf32> to vector<4x241xf32>
    %c6 = arith.constant 6 : index
    %c0_67 = arith.constant 0 : index
    %67 = vector.load %arg8[%c6, %c0_67] : memref<9x256xf32, #tpu.memory_space<vmem>>, vector<1x241xf32>
    %68 = vector.broadcast %67 : vector<1x241xf32> to vector<4x241xf32>
    %69 = arith.mulf %66, %68 : vector<4x241xf32>
    %c24_68 = arith.constant 24 : index
    %c0_69 = arith.constant 0 : index
    %70 = vector.load %arg10[%c24_68, %c0_69] : memref<36x256xf32, #tpu.memory_space<vmem>>, vector<4x241xf32>
    tpu.vector_store %arg10[%c24_68, %c0_69], %69 {strides = array<i32>} : memref<36x256xf32, #tpu.memory_space<vmem>>, vector<4x241xf32>,
    %c0_70 = arith.constant 0 : index
    %c0_71 = arith.constant 0 : index
    %c16_72 = arith.constant 16 : index
    %71 = vector.load %arg1[%c0_70, %c0_71, %c16_72] : memref<1x4x256xf32, #tpu.memory_space<vmem>>, vector<1x4x240xf32>
    %72 = vector.shape_cast %71 : vector<1x4x240xf32> to vector<4x240xf32>
    %c7 = arith.constant 7 : index
    %c0_73 = arith.constant 0 : index
    %73 = vector.load %arg8[%c7, %c0_73] : memref<9x256xf32, #tpu.memory_space<vmem>>, vector<1x240xf32>
    %74 = vector.broadcast %73 : vector<1x240xf32> to vector<4x240xf32>
    %75 = arith.mulf %72, %74 : vector<4x240xf32>
    %c28_74 = arith.constant 28 : index
    %c0_75 = arith.constant 0 : index
    %76 = vector.load %arg10[%c28_74, %c0_75] : memref<36x256xf32, #tpu.memory_space<vmem>>, vector<4x240xf32>
    tpu.vector_store %arg10[%c28_74, %c0_75], %75 {strides = array<i32>} : memref<36x256xf32, #tpu.memory_space<vmem>>, vector<4x240xf32>,
    %c0_76 = arith.constant 0 : index
    %c0_77 = arith.constant 0 : index
    %c17_78 = arith.constant 17 : index
    %77 = vector.load %arg1[%c0_76, %c0_77, %c17_78] : memref<1x4x256xf32, #tpu.memory_space<vmem>>, vector<1x4x239xf32>
    %78 = vector.shape_cast %77 : vector<1x4x239xf32> to vector<4x239xf32>
    %c8_79 = arith.constant 8 : index
    %c0_80 = arith.constant 0 : index
    %79 = vector.load %arg8[%c8_79, %c0_80] : memref<9x256xf32, #tpu.memory_space<vmem>>, vector<1x239xf32>
    %80 = vector.broadcast %79 : vector<1x239xf32> to vector<4x239xf32>
    %81 = arith.mulf %78, %80 : vector<4x239xf32>
    %c32_81 = arith.constant 32 : index
    %c0_82 = arith.constant 0 : index
    %82 = vector.load %arg10[%c32_81, %c0_82] : memref<36x256xf32, #tpu.memory_space<vmem>>, vector<4x239xf32>
    tpu.vector_store %arg10[%c32_81, %c0_82], %81 {strides = array<i32>} : memref<36x256xf32, #tpu.memory_space<vmem>>, vector<4x239xf32>,
    %c0_83 = arith.constant 0 : index
    %c0_84 = arith.constant 0 : index
    %83 = vector.load %arg2[%c0_83, %c0_84] : memref<8x36xf32, #tpu.memory_space<vmem>>, vector<8x36xf32>
    %c0_85 = arith.constant 0 : index
    %c0_86 = arith.constant 0 : index
    %84 = vector.load %arg10[%c0_85, %c0_86] : memref<36x256xf32, #tpu.memory_space<vmem>>, vector<36x256xf32>
    %cst_87 = arith.constant dense<0.000000e+00> : vector<8x256xf32>
    %85 = tpu.matmul %83, %84, %cst_87 {dimension_numbers = #tpu.dot_dimension_numbers<[1], [0], [0], [1], [0, 0, 1, 1], [], []>} : vector<8x36xf32>, vector<36x256xf32>, vector<8x256xf32> -> vector<8x256xf32>
    %c0_88 = arith.constant 0 : index
    %c0_89 = arith.constant 0 : index
    %86 = vector.load %arg3[%c0_88, %c0_89] : memref<8x1xf32, #tpu.memory_space<vmem>>, vector<8x1xf32>
    %87 = vector.broadcast %86 : vector<8x1xf32> to vector<8x256xf32>
    %88 = arith.mulf %85, %87 : vector<8x256xf32>
    %c0_90 = arith.constant 0 : index
    %c0_91 = arith.constant 0 : index
    %89 = vector.load %arg4[%c0_90, %c0_91] : memref<8x1xf32, #tpu.memory_space<vmem>>, vector<8x1xf32>
    %90 = vector.broadcast %89 : vector<8x1xf32> to vector<8x256xf32>
    %91 = arith.addf %88, %90 : vector<8x256xf32>
    %cst_92 = arith.constant 0.000000e+00 : f32
    %92 = vector.broadcast %cst_92 : f32 to vector<8x256xf32>
    %93 = arith.maximumf %91, %92 : vector<8x256xf32>
    %c0_93 = arith.constant 0 : index
    %c0_94 = arith.constant 0 : index
    %94 = vector.load %arg12[%c0_93, %c0_94] : memref<8x256xf32, #tpu.memory_space<vmem>>, vector<8x256xf32>
    tpu.vector_store %arg12[%c0_93, %c0_94], %93 {strides = array<i32>} : memref<8x256xf32, #tpu.memory_space<vmem>>, vector<8x256xf32>,
    %c0_95 = arith.constant 0 : index
    %c0_96 = arith.constant 0 : index
    %95 = vector.load %arg12[%c0_95, %c0_96] : memref<8x256xf32, #tpu.memory_space<vmem>>, vector<8x239xf32>
    %c0_97 = arith.constant 0 : index
    %c17_98 = arith.constant 17 : index
    %96 = vector.load %arg8[%c0_97, %c17_98] : memref<9x256xf32, #tpu.memory_space<vmem>>, vector<1x239xf32>
    %97 = vector.broadcast %96 : vector<1x239xf32> to vector<8x239xf32>
    %98 = arith.mulf %95, %97 : vector<8x239xf32>
    %c0_99 = arith.constant 0 : index
    %c17_100 = arith.constant 17 : index
    %99 = vector.load %arg11[%c0_99, %c17_100] : memref<72x256xf32, #tpu.memory_space<vmem>>, vector<8x239xf32>
    tpu.vector_store %arg11[%c0_99, %c17_100], %98 {strides = array<i32>} : memref<72x256xf32, #tpu.memory_space<vmem>>, vector<8x239xf32>,
    %c0_101 = arith.constant 0 : index
    %c0_102 = arith.constant 0 : index
    %100 = vector.load %arg12[%c0_101, %c0_102] : memref<8x256xf32, #tpu.memory_space<vmem>>, vector<8x240xf32>
    %c1_103 = arith.constant 1 : index
    %c16_104 = arith.constant 16 : index
    %101 = vector.load %arg8[%c1_103, %c16_104] : memref<9x256xf32, #tpu.memory_space<vmem>>, vector<1x240xf32>
    %102 = vector.broadcast %101 : vector<1x240xf32> to vector<8x240xf32>
    %103 = arith.mulf %100, %102 : vector<8x240xf32>
    %c8_105 = arith.constant 8 : index
    %c16_106 = arith.constant 16 : index
    %104 = vector.load %arg11[%c8_105, %c16_106] : memref<72x256xf32, #tpu.memory_space<vmem>>, vector<8x240xf32>
    tpu.vector_store %arg11[%c8_105, %c16_106], %103 {strides = array<i32>} : memref<72x256xf32, #tpu.memory_space<vmem>>, vector<8x240xf32>,
    %c0_107 = arith.constant 0 : index
    %c0_108 = arith.constant 0 : index
    %105 = vector.load %arg12[%c0_107, %c0_108] : memref<8x256xf32, #tpu.memory_space<vmem>>, vector<8x241xf32>
    %c2_109 = arith.constant 2 : index
    %c15_110 = arith.constant 15 : index
    %106 = vector.load %arg8[%c2_109, %c15_110] : memref<9x256xf32, #tpu.memory_space<vmem>>, vector<1x241xf32>
    %107 = vector.broadcast %106 : vector<1x241xf32> to vector<8x241xf32>
    %108 = arith.mulf %105, %107 : vector<8x241xf32>
    %c16_111 = arith.constant 16 : index
    %c15_112 = arith.constant 15 : index
    %109 = vector.load %arg11[%c16_111, %c15_112] : memref<72x256xf32, #tpu.memory_space<vmem>>, vector<8x241xf32>
    tpu.vector_store %arg11[%c16_111, %c15_112], %108 {strides = array<i32>} : memref<72x256xf32, #tpu.memory_space<vmem>>, vector<8x241xf32>,
    %c0_113 = arith.constant 0 : index
    %c0_114 = arith.constant 0 : index
    %110 = vector.load %arg12[%c0_113, %c0_114] : memref<8x256xf32, #tpu.memory_space<vmem>>, vector<8x255xf32>
    %c3_115 = arith.constant 3 : index
    %c1_116 = arith.constant 1 : index
    %111 = vector.load %arg8[%c3_115, %c1_116] : memref<9x256xf32, #tpu.memory_space<vmem>>, vector<1x255xf32>
    %112 = vector.broadcast %111 : vector<1x255xf32> to vector<8x255xf32>
    %113 = arith.mulf %110, %112 : vector<8x255xf32>
    %c24_117 = arith.constant 24 : index
    %c1_118 = arith.constant 1 : index
    %114 = vector.load %arg11[%c24_117, %c1_118] : memref<72x256xf32, #tpu.memory_space<vmem>>, vector<8x255xf32>
    tpu.vector_store %arg11[%c24_117, %c1_118], %113 {strides = array<i32>} : memref<72x256xf32, #tpu.memory_space<vmem>>, vector<8x255xf32>,
    %c0_119 = arith.constant 0 : index
    %c0_120 = arith.constant 0 : index
    %115 = vector.load %arg12[%c0_119, %c0_120] : memref<8x256xf32, #tpu.memory_space<vmem>>, vector<8x256xf32>
    %c32_121 = arith.constant 32 : index
    %c0_122 = arith.constant 0 : index
    %116 = vector.load %arg11[%c32_121, %c0_122] : memref<72x256xf32, #tpu.memory_space<vmem>>, vector<8x256xf32>
    tpu.vector_store %arg11[%c32_121, %c0_122], %115 {strides = array<i32>} : memref<72x256xf32, #tpu.memory_space<vmem>>, vector<8x256xf32>,
    %c0_123 = arith.constant 0 : index
    %c1_124 = arith.constant 1 : index
    %117 = vector.load %arg12[%c0_123, %c1_124] : memref<8x256xf32, #tpu.memory_space<vmem>>, vector<8x255xf32>
    %c5_125 = arith.constant 5 : index
    %c0_126 = arith.constant 0 : index
    %118 = vector.load %arg8[%c5_125, %c0_126] : memref<9x256xf32, #tpu.memory_space<vmem>>, vector<1x255xf32>
    %119 = vector.broadcast %118 : vector<1x255xf32> to vector<8x255xf32>
    %120 = arith.mulf %117, %119 : vector<8x255xf32>
    %c40_127 = arith.constant 40 : index
    %c0_128 = arith.constant 0 : index
    %121 = vector.load %arg11[%c40_127, %c0_128] : memref<72x256xf32, #tpu.memory_space<vmem>>, vector<8x255xf32>
    tpu.vector_store %arg11[%c40_127, %c0_128], %120 {strides = array<i32>} : memref<72x256xf32, #tpu.memory_space<vmem>>, vector<8x255xf32>,
    %c0_129 = arith.constant 0 : index
    %c15_130 = arith.constant 15 : index
    %122 = vector.load %arg12[%c0_129, %c15_130] : memref<8x256xf32, #tpu.memory_space<vmem>>, vector<8x241xf32>
    %c6_131 = arith.constant 6 : index
    %c0_132 = arith.constant 0 : index
    %123 = vector.load %arg8[%c6_131, %c0_132] : memref<9x256xf32, #tpu.memory_space<vmem>>, vector<1x241xf32>
    %124 = vector.broadcast %123 : vector<1x241xf32> to vector<8x241xf32>
    %125 = arith.mulf %122, %124 : vector<8x241xf32>
    %c48_133 = arith.constant 48 : index
    %c0_134 = arith.constant 0 : index
    %126 = vector.load %arg11[%c48_133, %c0_134] : memref<72x256xf32, #tpu.memory_space<vmem>>, vector<8x241xf32>
    tpu.vector_store %arg11[%c48_133, %c0_134], %125 {strides = array<i32>} : memref<72x256xf32, #tpu.memory_space<vmem>>, vector<8x241xf32>,
    %c0_135 = arith.constant 0 : index
    %c16_136 = arith.constant 16 : index
    %127 = vector.load %arg12[%c0_135, %c16_136] : memref<8x256xf32, #tpu.memory_space<vmem>>, vector<8x240xf32>
    %c7_137 = arith.constant 7 : index
    %c0_138 = arith.constant 0 : index
    %128 = vector.load %arg8[%c7_137, %c0_138] : memref<9x256xf32, #tpu.memory_space<vmem>>, vector<1x240xf32>
    %129 = vector.broadcast %128 : vector<1x240xf32> to vector<8x240xf32>
    %130 = arith.mulf %127, %129 : vector<8x240xf32>
    %c56_139 = arith.constant 56 : index
    %c0_140 = arith.constant 0 : index
    %131 = vector.load %arg11[%c56_139, %c0_140] : memref<72x256xf32, #tpu.memory_space<vmem>>, vector<8x240xf32>
    tpu.vector_store %arg11[%c56_139, %c0_140], %130 {strides = array<i32>} : memref<72x256xf32, #tpu.memory_space<vmem>>, vector<8x240xf32>,
    %c0_141 = arith.constant 0 : index
    %c17_142 = arith.constant 17 : index
    %132 = vector.load %arg12[%c0_141, %c17_142] : memref<8x256xf32, #tpu.memory_space<vmem>>, vector<8x239xf32>
    %c8_143 = arith.constant 8 : index
    %c0_144 = arith.constant 0 : index
    %133 = vector.load %arg8[%c8_143, %c0_144] : memref<9x256xf32, #tpu.memory_space<vmem>>, vector<1x239xf32>
    %134 = vector.broadcast %133 : vector<1x239xf32> to vector<8x239xf32>
    %135 = arith.mulf %132, %134 : vector<8x239xf32>
    %c64_145 = arith.constant 64 : index
    %c0_146 = arith.constant 0 : index
    %136 = vector.load %arg11[%c64_145, %c0_146] : memref<72x256xf32, #tpu.memory_space<vmem>>, vector<8x239xf32>
    tpu.vector_store %arg11[%c64_145, %c0_146], %135 {strides = array<i32>} : memref<72x256xf32, #tpu.memory_space<vmem>>, vector<8x239xf32>,
    %c0_147 = arith.constant 0 : index
    %c0_148 = arith.constant 0 : index
    %137 = vector.load %arg5[%c0_147, %c0_148] : memref<8x72xf32, #tpu.memory_space<vmem>>, vector<8x72xf32>
    %c0_149 = arith.constant 0 : index
    %c0_150 = arith.constant 0 : index
    %138 = vector.load %arg11[%c0_149, %c0_150] : memref<72x256xf32, #tpu.memory_space<vmem>>, vector<72x256xf32>
    %cst_151 = arith.constant dense<0.000000e+00> : vector<8x256xf32>
    %139 = tpu.matmul %137, %138, %cst_151 {dimension_numbers = #tpu.dot_dimension_numbers<[1], [0], [0], [1], [0, 0, 1, 1], [], []>} : vector<8x72xf32>, vector<72x256xf32>, vector<8x256xf32> -> vector<8x256xf32>
    %c0_152 = arith.constant 0 : index
    %c0_153 = arith.constant 0 : index
    %140 = vector.load %arg6[%c0_152, %c0_153] : memref<8x1xf32, #tpu.memory_space<vmem>>, vector<8x1xf32>
    %141 = vector.broadcast %140 : vector<8x1xf32> to vector<8x256xf32>
    %142 = arith.mulf %139, %141 : vector<8x256xf32>
    %c0_154 = arith.constant 0 : index
    %c0_155 = arith.constant 0 : index
    %143 = vector.load %arg7[%c0_154, %c0_155] : memref<8x1xf32, #tpu.memory_space<vmem>>, vector<8x1xf32>
    %144 = vector.broadcast %143 : vector<8x1xf32> to vector<8x256xf32>
    %145 = arith.addf %142, %144 : vector<8x256xf32>
    %c0_156 = arith.constant 0 : index
    %c0_157 = arith.constant 0 : index
    %c0_158 = arith.constant 0 : index
    %146 = vector.load %arg9[%c0_156, %c0_157, %c0_158] : memref<1x8x256xf32, #tpu.memory_space<vmem>>, vector<1x8x256xf32>
    %147 = vector.shape_cast %146 : vector<1x8x256xf32> to vector<8x256xf32>
    %148 = vector.shape_cast %145 : vector<8x256xf32> to vector<1x8x256xf32>
    tpu.vector_store %arg9[%c0_156, %c0_157, %c0_158], %148 {strides = array<i32>} : memref<1x8x256xf32, #tpu.memory_space<vmem>>, vector<1x8x256xf32>,
    return
  }
  func.func @transform_0(%arg0: i32) -> (i32, i32, i32) {
    %c0_i32 = arith.constant 0 : i32
    %c0_i32_0 = arith.constant 0 : i32
    %c0_i32_1 = arith.constant 0 : i32
    return %arg0, %c0_i32, %c0_i32_0 : i32, i32, i32
  }
  func.func @transform_1(%arg0: i32) -> (i32, i32) {
    %c0_i32 = arith.constant 0 : i32
    %c0_i32_0 = arith.constant 0 : i32
    %c0_i32_1 = arith.constant 0 : i32
    return %c0_i32, %c0_i32_0 : i32, i32
  }
  func.func @transform_2(%arg0: i32) -> (i32, i32) {
    %c0_i32 = arith.constant 0 : i32
    %c0_i32_0 = arith.constant 0 : i32
    %c0_i32_1 = arith.constant 0 : i32
    return %c0_i32, %c0_i32_0 : i32, i32
  }
  func.func @transform_3(%arg0: i32) -> (i32, i32) {
    %c0_i32 = arith.constant 0 : i32
    %c0_i32_0 = arith.constant 0 : i32
    %c0_i32_1 = arith.constant 0 : i32
    return %c0_i32, %c0_i32_0 : i32, i32
  }
  func.func @transform_4(%arg0: i32) -> (i32, i32) {
    %c0_i32 = arith.constant 0 : i32
    %c0_i32_0 = arith.constant 0 : i32
    %c0_i32_1 = arith.constant 0 : i32
    return %c0_i32, %c0_i32_0 : i32, i32
  }
  func.func @transform_5(%arg0: i32) -> (i32, i32) {
    %c0_i32 = arith.constant 0 : i32
    %c0_i32_0 = arith.constant 0 : i32
    %c0_i32_1 = arith.constant 0 : i32
    return %c0_i32, %c0_i32_0 : i32, i32
  }
  func.func @transform_6(%arg0: i32) -> (i32, i32) {
    %c0_i32 = arith.constant 0 : i32
    %c0_i32_0 = arith.constant 0 : i32
    %c0_i32_1 = arith.constant 0 : i32
    return %c0_i32, %c0_i32_0 : i32, i32
  }
  func.func @transform_7(%arg0: i32) -> (i32, i32) {
    %c0_i32 = arith.constant 0 : i32
    %c0_i32_0 = arith.constant 0 : i32
    %c0_i32_1 = arith.constant 0 : i32
    return %c0_i32, %c0_i32_0 : i32, i32
  }
  func.func @transform_8(%arg0: i32) -> (i32, i32, i32) {
    %c0_i32 = arith.constant 0 : i32
    %c0_i32_0 = arith.constant 0 : i32
    %c0_i32_1 = arith.constant 0 : i32
    return %arg0, %c0_i32, %c0_i32_0 : i32, i32, i32
  }
}

</mosaic_0001>

<bundles_post_ra>
// kernel: tpu_custom_call.1
= control target key start
LH: loop header
LB: loop body
LE: loop exit
PB: predicated region body
PF: predicated region fallthrough
CT: control target
= control target key end

     0   :  { %13 = vsyncpa [#allocation6], 0  ;;  %s1868_s0 = inlined_call_operand.vmem [shape: f32[2,4,256], index: 0, kind: input, shape index: {}]   ;;  %s1869_s1 = inlined_call_operand.hbm [shape: f32[8,36], index: 1, kind: input, shape index: {}]   ;;  %s1870_s2 = inlined_call_operand.vmem [shape: f32[8,1], index: 2, kind: input, shape index: {}]   ;;  %s1871_s3 = inlined_call_operand.vmem [shape: f32[8,1], index: 3, kind: input, shape index: {}]   ;;  %s1872_s4 = inlined_call_operand.hbm [shape: f32[8,72], index: 4, kind: input, shape index: {}]   ;;  %s1873_s5 = inlined_call_operand.vmem [shape: f32[8,1], index: 5, kind: input, shape index: {}]   ;;  %s1874_s6 = inlined_call_operand.vmem [shape: f32[8,1], index: 6, kind: input, shape index: {}]   ;;  %s1875_s7 = inlined_call_operand.vmem [shape: f32[9,256], index: 7, kind: input, shape index: {}]   ;;  %s1876_s8 = inlined_call_operand.hbm [shape: f32[2,8,256], index: 8, kind: output, shape index: {}]  }
   0x1   :  { %14 = vsyncpa [#allocation9], 0 }
   0x2   :  { %15 = vsyncpa [#allocation7], 0 }
   0x3   :  { %17 = vsyncpa [#allocation7 + $0x1], 0  ;;  %s1492_s27 = smov 0   ;;  %s1494_s28 = smov 0  }
   0x4   :  { %s1496_s29 = smov 0   ;;  %s1498_s30 = smov 0  }
   0x5 LB: > { %s1513_s9 = sadd.s32 4294967295, %s1432_s30   ;;  %s1204_s10 = sadd.s32 4294967294, %s1432_s30   ;;  %s1432_s30 = sphi %s1498_s30, %s1903_s30   ;;  %s1428_s29 = sphi %s1496_s29, %s1902_s29   ;;  %s1424_s28 = sphi %s1494_s28, %s1901_s28   ;;  %s1420_s27 = sphi %s1492_s27, %s1900_s27  }
   0x6   : > { %s1517_s11 = sadd.s32 1, %s1432_s30   ;;  %s203_s12 = sadd.s32 1, %s1428_s29 }
   0x7   : > { %s200_s13 = ssub.s32 %s1432_s30, %s1517_s11  ;;  %p213_p0 = scmp.ne.s32.totalorder %s1428_s29, %s1424_s28 }
   0x8   : > { %p201_p1 = scmp.eq.s32.totalorder %s200_s13, 0  ;;  %p214_p2 = scmp.eq.s32.totalorder %s1513_s9, 1 }
   0x9   : > { %p219_p3 = scmp.ne.s32.totalorder %s1424_s28, %s1420_s27  ;;  %p220_p4 = scmp.eq.s32.totalorder %s1204_s10, 1 }
   0xa   : > { %s1528_s14 = scalar_select %p201_p1, %s1428_s29, %s203_s12  }
   0xb   : > { %p1530_p5 = por %p214_p2, %p213_p0  ;;  %p1534_p6 = por %p220_p4, %p219_p3 }
   0xc   : > { %p1205_p7 = scmp.ge.s32.totalorder %s1432_s30, 1  ;;  %p227_p8 = scmp.lt.s32.totalorder %s1432_s30, 3 }
   0xd   : > { %s1886_s15 = scalar_select %p1530_p5, 1, 0 }
   0xe   : > { %s1887_s16 = scalar_select %p1534_p6, 1, 0 }
   0xf   : > { %p1877_p9 = scmp.eq.s32.totalorder %s1513_s9, 0  ;;  %p1541_p10 = pnand %p1205_p7, %p227_p8 }
  0x10   : > { %s1434_s18 = smov [#allocation5]   ;;  %s1435_s20 = smov [#allocation8]  }
  0x11   : > { %s1888_s17 = scalar_select %p1541_p10, 1, 0 }
  0x12   : > { %s240_s19 = sshll.u32 %s1434_s18, 4  ;;  %p1250_p11 = pneg %p1541_p10  ;;  %s241_s19 = int_to_ptr.vmem [resolvable:$true] %s240_s19 }
  0x13   : > { %s257_s21 = sshll.u32 %s1435_s20, 4  ;;  %s1323_s23 = scalar_lea.vmem %s241_s19, 128  ;;  %s258_s21 = int_to_ptr.vmem [resolvable:$true] %s257_s21 }
  0x14   : > { %p1549_p12 = pnand %p1877_p9, %p1250_p11  ;;  %p1324_p0 = scmp.ne.s32.totalorder %s241_s19, %s1323_s23 }
  0x15   : > { %p1331_p3 = scmp.lt.s32.totalorder %s241_s19, %s241_s19  ;;  %p1332_p4 = scmp.lt.s32.totalorder %s1323_s23, %s1323_s23 }
  0x16   : > { %p1314_p13 = pneg %p1549_p12 }
  0x17   : > { %p1333_p7 = por %p1332_p4, %p1331_p3 }
  0x18   : > { %p1326_p1 = pnand %p1324_p0, %p1314_p13 }
  0x1a   : > { %p1327_p2 = pneg %p1326_p1 }
  0x1c   : > { %p1334_p8 = pnand %p1333_p7, %p1327_p2 }
  0x1e   : > { %1337 = shalt.err (!%p1334_p8)
}
  0x1f   : > { %1253 = dma.hbm_to_vmem [thread:$0]  (!%p1549_p12), %s1869_s1, 128, %s241_s19, [#allocation6]  }
  0x20   : > { %s1349_s26 = scalar_lea.vmem %s258_s21, 128  ;;  %p1357_p0 = scmp.lt.s32.totalorder %s258_s21, %s258_s21 }
  0x21   : > { %p1350_p11 = scmp.ne.s32.totalorder %s258_s21, %s1349_s26  ;;  %p1358_p1 = scmp.lt.s32.totalorder %s1349_s26, %s1349_s26 }
  0x23   : > { %p1352_p9 = pnand %p1350_p11, %p1314_p13  ;;  %p1359_p5 = por %p1358_p1, %p1357_p0 }
  0x25   : > { %p1353_p6 = pneg %p1352_p9 }
  0x27   : > { %p1360_p10 = pnand %p1359_p5, %p1353_p6 }
  0x29   : > { %1363 = shalt.err (!%p1360_p10)
}
  0x2a   : > { %1256 = dma.hbm_to_vmem [thread:$0]  (!%p1549_p12), %s1872_s4, 128, %s258_s21, [#allocation9]  }
  0x2b   : > { %p1890_p2 = scmp.ne.s32.totalorder %s1888_s17, 0 }
  0x2c   : > { %p1891_p3 = scmp.eq.s32.totalorder (!%p1890_p2), %s1513_s9, 0 }
  0x2d   : > { %287 = sbr.rel (%p1890_p2) target bundleno = 903 (0x387), region = 52 }
  0x32   : > { %1407 = dma.done.wait (%p1891_p3), [#allocation6], 128   ;;  %p1892_p13 = pmov %p1891_p3 }
  0x33   : > { %p1893_p9 = pmov %p1891_p3 }
  0x34   : > { %1409 = vsyncadd (%p1892_p13), [#allocation6], 4294967168 }
  0x35   : > { %1411 = dma.done.wait (%p1893_p9), [#allocation9], 128   ;;  %p1894_p5 = pmov %p1891_p3 }
  0x36   : > { %v365_v0 = vlaneseq  ;;  %p325_p6 = scmp.lt.s32.totalorder %s1513_s9, 1  ;;  %v1221_v4 = vld [vmem:[%s1875_s7 + $0x10] ss:$8 sm:$0x3]  ;;  %s1436_s18 = smov 17   ;;  %vm346_vm0 = vcmask 138240  }
  0x37   : > { %1413 = vsyncadd (%p1894_p5), [#allocation9], 4294967168  ;;  %v1220_v5 = vld [vmem:[%s1875_s7 + $0x7] ss:$8 sm:$0x3]  ;;  %s1437_s19 = smov 16  }
  0x38   : > { %v366_v1 = vshrl.u32 %v365_v0, 7  ;;  %s1587_s13 = scalar_select %p325_p6, %s1513_s9, 1  ;;  %v1219_v10 = vld [vmem:[%s1875_s7 + $0x6] ss:$8 sm:$0x3]  ;;  %vm348_vm1 = vcmask 130048  }
  0x39   : > { %v1218_v11 = vld [vmem:[%s1875_s7 + $0x5] ss:$8 sm:$0x3]  ;;  %v1217_v16 = vld [vmem:[%s1875_s7 + $0x3] ss:$8 sm:$0x3] }
  0x3a   : > { %v1581_v2 = vsub.s32 0, %v366_v1  ;;  %v1583_v3 = vsub.s32 1, %v366_v1  ;;  %v1216_v17 = vld [vmem:[%s1875_s7 + $0x2] ss:$8 sm:$0x3]  ;;  %s1238_s17 = sshll.u32 %s1587_s13, 3 }
  0x3b   : > { %v363_v26 = vld [vmem:[%s1875_s7] ss:$8 sm:$0x3]  ;;  %s329_s24 = scalar_lea.vmem %s1868_s0, %s1238_s17  ;;  %v1215_v27 = vld [vmem:[%s1875_s7 + $0x1] ss:$8 sm:$0x3] }
  0x3c   : > { %v595_v6 = vrot.slane %v1221_v4, %v1581_v2  ;;  %v599_v7 = vrot.slane %v1221_v4, %v1583_v3  ;;  %v564_v8 = vrot.slane %v1220_v5, %v1581_v2  ;;  %v568_v9 = vrot.slane %v1220_v5, %v1583_v3  ;;  %v1631_v28 = vld [vmem:[%s329_s24] sm:$0xff]  ;;  %s1438_s26 = smov 15   ;;  %s1439_s10 = smov 1  }
  0x3d   : > { %v533_v12 = vrot.slane %v1219_v10, %v1581_v2  ;;  %v537_v13 = vrot.slane %v1219_v10, %v1583_v3  ;;  %v502_v14 = vrot.slane %v1218_v11, %v1581_v2  ;;  %v506_v15 = vrot.slane %v1218_v11, %v1583_v3  ;;  %493 = vst [vmem:[#allocation2 + $0x20] sm:$0xf] %v1631_v28  ;;  %s1440_s12 = smov 127   ;;  %s1884_s17 = smov 113  }
  0x3e   : > { %v600_v18 = vcombine.low %v595_v6, %v599_v7  ;;  %v569_v19 = vcombine.low %v564_v8, %v568_v9  ;;  %v464_v21 = vrot.slane %v1217_v16, %v1581_v2  ;;  %v468_v22 = vrot.slane %v1217_v16, %v1583_v3  ;;  %s1880_s20 = smov 111   ;;  %s1882_s21 = smov 112  }
  0x3f   : > { %v538_v20 = vcombine.low %v533_v12, %v537_v13  ;;  %v507_v23 = vcombine.low %v502_v14, %v506_v15  ;;  %v432_v24 = vrot.slane %v1216_v17, %v1581_v2  ;;  %v436_v25 = vrot.slane %v1216_v17, %v1583_v3  ;;  %s1896_s24 = smov 112   ;;  %s1897_s13 = smov 111  }
  0x40   : > { %601 = vrot.lane.b32.xlu0 %v600_v18, %s1436_s18  ;;  %570 = vrot.lane.b32.xlu1 %v569_v19, %s1437_s19  ;;  %v469_v29 = vcombine.low %v464_v21, %v468_v22  ;;  %v368_v30 = vrot.slane %v363_v26, %v1581_v2  ;;  %v372_v31 = vrot.slane %v363_v26, %v1583_v3  ;;  %vm350_vm2 = vcmask 121856   ;;  %v712_v18 = vld [vmem:[%s1870_s2] sm:$0xff]  ;;  %p1898_p12 = scmp.ne.s32.totalorder %s1886_s15, 0 }
  0x41   : > { %v437_v32 = vcombine.low %v432_v24, %v436_v25  ;;  %v400_v33 = vrot.slane %v1215_v27, %v1581_v2  ;;  %v404_v34 = vrot.slane %v1215_v27, %v1583_v3  ;;  %vm352_vm3 = vcmask 7168   ;;  %v720_v19 = vld [vmem:[%s1871_s3] sm:$0xff] }
  0x42   : > { %v373_v35 = vcombine.low %v368_v30, %v372_v31  ;;  %vm342_vm4 = vcmask 1048452   ;;  %v1444_v37 = vmov 0.0   ;;  %vm338_vm5 = vcmask 1048572   ;;  %v1229_v26 = vld [vmem:[%s1875_s7 + $0x6] ss:$8 sm:$0x3] }
  0x43   : > { %v405_v36 = vcombine.low %v400_v33, %v404_v34  ;;  %343 = vst.msk [vmem:[#allocation2 + $0x38] sm:$0xf0] %vm342_vm4, %v1444_v37  ;;  %705 = vmatprep.mubr.f32.mxu0 %v1444_v37  ;;  %1083 = vmatprep.mubr.f32.mxu1 %v1444_v37  ;;  %v491_v38 = vcombine.high %v1631_v28, %v1631_v28  ;;  %vm334_vm6 = vcmask 117760   ;;  %vm344_vm7 = vcmask 1044344  }
  0x44   : > { %539 = vrot.lane.b32.xlu0 %v538_v20, %s1438_s26  ;;  %508 = vrot.lane.b32.xlu1 %v507_v23, %s1439_s10  ;;  %347 = vst.msk [vmem:[#allocation3] sm:$0xff] %vm346_vm0, %v1444_v37  ;;  %vm330_vm8 = vcmask 134144   ;;  %vm340_vm9 = vcmask 1044360   ;;  %vm473_vm10 = vcmask 1039360   ;;  %vm441_vm11 = vcmask 924672  }
  0x45   : > { %349 = vst.msk [vmem:[#allocation3 + $0x10] sm:$0xff] %vm348_vm1, %v1444_v37  ;;  %494 = vst [vmem:[#allocation2 + $0x28] sm:$0xf] %v491_v38  ;;  %vm377_vm12 = vcmask 908288   ;;  %vm336_vm13 = vcmask 7172   ;;  %vm332_vm14 = vcmask 130052   ;;  %v911_v27 = vrot.slane %v1229_v26, %v1583_v3 }
  0x46   : > { %351 = vst.msk [vmem:[#allocation3 + $0x20] sm:$0xff] %vm350_vm2, %v1444_v37  ;;  %vm409_vm15 = vcmask 916480   ;;  %v1445_v17 = vmov 0   ;;  %v1231_v20 = vld [vmem:[%s1875_s7 + $0x10] ss:$8 sm:$0x3] }
  0x47   : > { %353 = vst.msk [vmem:[#allocation3 + $0x30] sm:$0xff] %vm352_vm3, %v1444_v37  ;;  %1311 = vset.pattern.permute.xlu1 %v1445_v17  ;;  %1310 = vset.pattern.permute.xlu0 %v1445_v17  ;;  %v975_v21 = vrot.slane %v1231_v20, %v1583_v3  ;;  %v971_v22 = vrot.slane %v1231_v20, %v1581_v2  ;;  %v1230_v23 = vld [vmem:[%s1875_s7 + $0x7] ss:$8 sm:$0x3]  ;;  %vm586_vm4 = vcmask 916484  }
  0x48   : > { %470 = vrot.lane.b32.xlu1 %v469_v29, %s1440_s12  ;;  %438 = vrot.lane.b32.xlu0 %v437_v32, %s1884_s17  ;;  %339 = vst.msk [vmem:[#allocation2 + $0x28] sm:$0xf0] %vm338_vm5, %v1444_v37  ;;  %v943_v24 = vrot.slane %v1230_v23, %v1583_v3  ;;  %v939_v25 = vrot.slane %v1230_v23, %v1581_v2  ;;  %v1228_v29 = vld [vmem:[%s1875_s7 + $0x5] ss:$8 sm:$0x3]  ;;  %vm524_vm5 = vcmask 1039364  }
  0x49   : > { %335 = vst.msk [vmem:[#allocation2 + $0x10] sm:$0xf] %vm334_vm6, %v1444_v37  ;;  %v879_v30 = vrot.slane %v1228_v29, %v1583_v3  ;;  %v875_v31 = vrot.slane %v1228_v29, %v1581_v2  ;;  %v1227_v32 = vld [vmem:[%s1875_s7 + $0x3] ss:$8 sm:$0x3]  ;;  %vm454_vm6 = vcmask 1043576  }
  0x4a   : > { %345 = vst.msk [vmem:[#allocation2 + $0x48] sm:$0xf] %vm344_vm7, %v1444_v37  ;;  %v842_v33 = vrot.slane %v1227_v32, %v1583_v3  ;;  %v838_v34 = vrot.slane %v1227_v32, %v1581_v2  ;;  %vm617_vm7 = vcmask 904192  }
  0x4b   : > { %331 = vst.msk [vmem:[#allocation2] sm:$0xf] %vm330_vm8, %v1444_v37  ;;  %vm390_vm8 = vcmask 1043592  }
  0x4c   : > { %374 = vrot.lane.b32.xlu0 %v373_v35, %s1880_s20  ;;  %406 = vrot.lane.b32.xlu1 %v405_v36, %s1882_s21  ;;  %341 = vst.msk [vmem:[#allocation2 + $0x38] sm:$0xf] %vm340_vm9, %v1444_v37  ;;  %v1226_v35 = vld [vmem:[%s1875_s7 + $0x2] ss:$8 sm:$0x3]  ;;  %vm555_vm9 = vcmask 920576  }
  0x4d   : > { %337 = vst.msk [vmem:[#allocation2 + $0x10] sm:$0xf0] %vm336_vm13, %v1444_v37  ;;  %v809_v36 = vrot.slane %v1226_v35, %v1583_v3  ;;  %v805_v38 = vrot.slane %v1226_v35, %v1581_v2  ;;  %vm634_vm13 = vcmask 1043456  }
  0x4e   : > { %333 = vst.msk [vmem:[#allocation2] sm:$0xf0] %vm332_vm14, %v1444_v37  ;;  %vm486_vm14 = vcmask 1047564  }
  0xb2   : > { %v602_v39 = vpop.permute.xlu0 %601  ;;  %v571_v40 = vpop.permute.xlu1 %570 }
  0xb3   : > { %v603_v41 = vrot.slane %v602_v39, 4  ;;  %v572_v42 = vrot.slane %v571_v40, 4 }
  0xb5   : > { %v604_v43 = vsel %vm346_vm0, %v603_v41, %v602_v39  ;;  %v573_v44 = vsel %vm348_vm1, %v572_v42, %v571_v40  ;;  %v1225_v39 = vld [vmem:[%s1875_s7 + $0x1] ss:$8 sm:$0x3]  ;;  %v734_v42 = vld [vmem:[%s1875_s7] ss:$8 sm:$0x3] }
  0xb6   : > { %v606_v45 = vmul.f32 %v604_v43, %v1631_v28  ;;  %v575_v46 = vmul.f32 %v1631_v28, %v573_v44  ;;  %v540_v47 = vpop.permute.xlu0 %539  ;;  %v509_v48 = vpop.permute.xlu1 %508  ;;  %v776_v40 = vrot.slane %v1225_v39, %v1583_v3  ;;  %v772_v41 = vrot.slane %v1225_v39, %v1581_v2 }
  0xb7   : > { %v541_v49 = vrot.slane %v540_v47, 4  ;;  %v510_v50 = vrot.slane %v509_v48, 4  ;;  %v743_v43 = vrot.slane %v734_v42, %v1583_v3  ;;  %v739_v44 = vrot.slane %v734_v42, %v1581_v2 }
  0xb8   : > { %580 = vrot.lane.b32.xlu1 %v575_v46, %s1882_s21  ;;  %609 = vrot.lane.b32.xlu0 %v606_v45, %s1880_s20  ;;  %v608_v5 = vcombine.high %v606_v45, %v606_v45  ;;  %v577_v8 = vcombine.low %v575_v46, %v575_v46 }
  0xb9   : > { %v542_v51 = vsel %vm350_vm2, %v541_v49, %v540_v47  ;;  %v511_v52 = vsel %vm352_vm3, %v510_v50, %v509_v48 }
  0xba   : > { %v544_v53 = vmul.f32 %v1631_v28, %v542_v51  ;;  %v513_v54 = vmul.f32 %v1631_v28, %v511_v52  ;;  %v471_v55 = vpop.permute.xlu1 %470  ;;  %v439_v56 = vpop.permute.xlu0 %438 }
  0xbb   : > { %v472_v57 = vrot.slane %v471_v55, 4  ;;  %v440_v58 = vrot.slane %v439_v56, 4 }
  0xbc   : > { %518 = vrot.lane.b32.xlu1 %v513_v54, %s1440_s12  ;;  %547 = vrot.lane.b32.xlu0 %v544_v53, %s1884_s17  ;;  %v546_v7 = vcombine.high %v544_v53, %v544_v53  ;;  %v515_v11 = vcombine.low %v513_v54, %v513_v54 }
  0xbd   : > { %v474_v59 = vsel %vm473_vm10, %v471_v55, %v472_v57  ;;  %v442_v60 = vsel %vm441_vm11, %v439_v56, %v440_v58 }
  0xbe   : > { %v476_v61 = vmul.f32 %v1631_v28, %v474_v59  ;;  %v444_v62 = vmul.f32 %v1631_v28, %v442_v60  ;;  %v375_v63 = vpop.permute.xlu0 %374  ;;  %v407_v6 = vpop.permute.xlu1 %406 }
  0xbf   : > { %v376_v0 = vrot.slane %v375_v63, 4  ;;  %v408_v9 = vrot.slane %v407_v6, 4 }
  0xc0   : > { %481 = vrot.lane.b32.xlu1 %v476_v61, %s1439_s10  ;;  %447 = vrot.lane.b32.xlu0 %v444_v62, %s1438_s26  ;;  %v446_v10 = vcombine.high %v444_v62, %v444_v62  ;;  %v478_v14 = vcombine.low %v476_v61, %v476_v61 }
  0xc1   : > { %v378_v1 = vsel %vm377_vm12, %v375_v63, %v376_v0  ;;  %v410_v12 = vsel %vm409_vm15, %v407_v6, %v408_v9 }
  0xc2   : > { %v380_v4 = vmul.f32 %v1631_v28, %v378_v1  ;;  %v412_v13 = vmul.f32 %v1631_v28, %v410_v12  ;;  %v907_v28 = vrot.slane %v1229_v26, %v1581_v2 }
  0xc4   : > { %611 = vrot.lane.b32.xlu1 %v608_v5, %s1880_s20  ;;  %383 = vrot.lane.b32.xlu0 %v380_v4, %s1436_s18  ;;  %v382_v15 = vcombine.high %v380_v4, %v380_v4  ;;  %v414_v16 = vcombine.low %v412_v13, %v412_v13  ;;  %s1239_s20 = sshll.u32 %s1513_s9, 8 }
  0xc8   : > { %549 = vrot.lane.b32.xlu1 %v546_v7, %s1884_s17  ;;  %578 = vrot.lane.b32.xlu0 %v577_v8, %s1882_s21  ;;  %s1895_s17 = smov 113  }
  0xcc   : > { %449 = vrot.lane.b32.xlu1 %v446_v10, %s1438_s26  ;;  %516 = vrot.lane.b32.xlu0 %v515_v11, %s1440_s12 }
  0xd0   : > { %479 = vrot.lane.b32.xlu0 %v478_v14, %s1439_s10  ;;  %385 = vrot.lane.b32.xlu1 %v382_v15, %s1436_s18  ;;  %v619_v14 = vld [vmem:[#allocation5] sm:$0xff] }
  0xd4   : > { %415 = vrot.lane.b32.xlu0 %v414_v16, %s1437_s19  ;;  %417 = vrot.lane.b32.xlu1 %v412_v13, %s1437_s19 }
  0xd8   : > { %715 = vperm.xlu0 %1310, %v712_v18   ;;  %723 = vperm.xlu1 %1311, %v720_v19  }
  0xdc   : > { %978 = vrot.lane.b32.xlu0 %v975_v21, %s1436_s18  ;;  %976 = vrot.lane.b32.xlu1 %v971_v22, %s1436_s18 }
  0xe0   : > { %946 = vrot.lane.b32.xlu0 %v943_v24, %s1437_s19  ;;  %944 = vrot.lane.b32.xlu1 %v939_v25, %s1437_s19 }
  0xe4   : > { %914 = vrot.lane.b32.xlu0 %v911_v27, %s1438_s26  ;;  %912 = vrot.lane.b32.xlu1 %v907_v28, %s1438_s26 }
  0xe8   : > { %882 = vrot.lane.b32.xlu0 %v879_v30, %s1439_s10  ;;  %880 = vrot.lane.b32.xlu1 %v875_v31, %s1439_s10 }
  0xec   : > { %845 = vrot.lane.b32.xlu0 %v842_v33, %s1440_s12  ;;  %843 = vrot.lane.b32.xlu1 %v838_v34, %s1440_s12 }
  0xf0   : > { %812 = vrot.lane.b32.xlu0 %v809_v36, %s1895_s17  ;;  %810 = vrot.lane.b32.xlu1 %v805_v38, %s1895_s17 }
  0xf4   : > { %779 = vrot.lane.b32.xlu0 %v776_v40, %s1896_s24  ;;  %777 = vrot.lane.b32.xlu1 %v772_v41, %s1896_s24 }
  0xf8   : > { %746 = vrot.lane.b32.xlu0 %v743_v43, %s1897_s13  ;;  %744 = vrot.lane.b32.xlu1 %v739_v44, %s1897_s13 }
 0x12a   : > { %v581_v45 = vpop.permute.xlu1 %580  ;;  %v610_v46 = vpop.permute.xlu0 %609 }
 0x12b   : > { %587 = vst.msk [vmem:[#allocation2 + $0x38] sm:$0xf0] %vm586_vm4, %v581_v45  ;;  %vm422_vm4 = vcmask 1047684  }
 0x12e   : > { %v519_v47 = vpop.permute.xlu1 %518  ;;  %v548_v48 = vpop.permute.xlu0 %547 }
 0x12f   : > { %525 = vst.msk [vmem:[#allocation2 + $0x28] sm:$0xf0] %vm524_vm5, %v519_v47  ;;  %vm630_vm5 = vcmask 293888  }
 0x132   : > { %v482_v49 = vpop.permute.xlu1 %481  ;;  %v448_v50 = vpop.permute.xlu0 %447 }
 0x133   : > { %455 = vst.msk [vmem:[#allocation2 + $0x10] sm:$0xf] %vm454_vm6, %v448_v50  ;;  %vm360_vm6 = vcmask 1048440  }
 0x134   : > { %361 = vst.msk [vmem:[#allocation3 + $0x88] sm:$0xff] %vm360_vm6, %v1444_v37 }
 0x136   : > { %v612_v3 = vpop.permute.xlu1 %611  ;;  %v384_v2 = vpop.permute.xlu0 %383  ;;  %v625_v6 = vld [vmem:[#allocation2 + $0x28] sm:$0xff] }
 0x137   : > { %v613_v51 = vsel %vm377_vm12, %v610_v46, %v612_v3  ;;  %618 = vst.msk [vmem:[#allocation2 + $0x48] sm:$0xf] %vm617_vm7, %v612_v3  ;;  %vm358_vm7 = vcmask 1048448  }
 0x138   : > { %391 = vst.msk [vmem:[#allocation2] sm:$0xf] %vm390_vm8, %v384_v2  ;;  %616 = vst [vmem:[#allocation2 + $0x40] sm:$0xf] %v613_v51  ;;  %vm356_vm8 = vcmask 1048456  }
 0x139   : > { %359 = vst.msk [vmem:[#allocation3 + $0x78] sm:$0xff] %vm358_vm7, %v1444_v37 }
 0x13a   : > { %v550_v52 = vpop.permute.xlu1 %549  ;;  %v579_v53 = vpop.permute.xlu0 %578  ;;  %357 = vst.msk [vmem:[#allocation3 + $0x68] sm:$0xff] %vm356_vm8, %v1444_v37 }
 0x13b   : > { %v551_v54 = vsel %vm441_vm11, %v548_v48, %v550_v52  ;;  %556 = vst.msk [vmem:[#allocation2 + $0x38] sm:$0xf] %vm555_vm9, %v550_v52  ;;  %v582_v55 = vsel %vm409_vm15, %v579_v53, %v581_v45  ;;  %vm354_vm9 = vcmask 1048568  }
 0x13c   : > { %554 = vst [vmem:[#allocation2 + $0x30] sm:$0xf] %v551_v54  ;;  %585 = vst [vmem:[#allocation2 + $0x30] sm:$0xf0] %v582_v55 }
 0x13d   : > { %355 = vst.msk [vmem:[#allocation3 + $0x58] sm:$0xff] %vm354_vm9, %v1444_v37 }
 0x13e   : > { %v450_v56 = vpop.permute.xlu1 %449  ;;  %v517_v57 = vpop.permute.xlu0 %516  ;;  %v629_v58 = vld [vmem:[#allocation2 + $0x48] sm:$0xf] }
 0x13f   : > { %v451_v59 = vsel %vm350_vm2, %v448_v50, %v450_v56  ;;  %v520_v60 = vsel %vm473_vm10, %v517_v57, %v519_v47  ;;  %1222 = vmatprep.subr.msk.mxu0 %vm634_vm13, %v629_v58  ;;  %v628_v61 = vld [vmem:[#allocation2 + $0x40] sm:$0xf] }
 0x140   : > { %456 = vst [vmem:[#allocation2 + $0x18] sm:$0xf] %v451_v59  ;;  %523 = vst [vmem:[#allocation2 + $0x20] sm:$0xf0] %v520_v60  ;;  %1223 = vmatpush1.msk.msra.mxu0 %vm634_vm13, %v628_v61  ;;  %vm861_vm13 = vcmask 1047560  }
 0x142   : > { %v480_v62 = vpop.permute.xlu0 %479  ;;  %v386_v63 = vpop.permute.xlu1 %385  ;;  %v627_v0 = vld [vmem:[#allocation2 + $0x38] sm:$0xff] }
 0x143   : > { %v483_v1 = vsel %vm352_vm3, %v480_v62, %v482_v49  ;;  %487 = vst.msk [vmem:[#allocation2 + $0x10] sm:$0xf0] %vm486_vm14, %v480_v62  ;;  %v387_v4 = vsel %vm346_vm0, %v384_v2, %v386_v63  ;;  %665 = vmatprep.subr.mxu0 %v627_v0  ;;  %v626_v5 = vld [vmem:[#allocation2 + $0x30] sm:$0xff]  ;;  %v1090_v0 = vld [vmem:[%s1873_s5] sm:$0xff] }
 0x144   : > { %488 = vst [vmem:[#allocation2 + $0x18] sm:$0xf0] %v483_v1  ;;  %392 = vst [vmem:[#allocation2 + $0x8] sm:$0xf] %v387_v4  ;;  %666 = vmatpush1.msra.mxu0 %v626_v5  ;;  %v1098_v1 = vld [vmem:[%s1874_s6] sm:$0xff] }
 0x145   : > { %667 = vmatprep.subr.mxu0 %v625_v6 }
 0x146   : > { %v416_v7 = vpop.permute.xlu0 %415  ;;  %v418_v8 = vpop.permute.xlu1 %417 }
 0x147   : > { %423 = vst.msk [vmem:[#allocation2] sm:$0xf0] %vm422_vm4, %v416_v7  ;;  %v419_v9 = vsel %vm348_vm1, %v416_v7, %v418_v8  ;;  %v624_v10 = vld [vmem:[#allocation2 + $0x20] sm:$0xff] }
 0x148   : > { %424 = vst [vmem:[#allocation2 + $0x8] sm:$0xf0] %v419_v9  ;;  %668 = vmatpush1.msra.mxu0 %v624_v10 }
 0x14a   : > { %v622_v12 = vld [vmem:[#allocation2 + $0x10] sm:$0xff] }
 0x14b   : > { %v623_v11 = vld [vmem:[#allocation2 + $0x18] sm:$0xff] }
 0x14c   : > { %669 = vmatprep.subr.mxu0 %v623_v11 }
 0x14d   : > { %670 = vmatpush1.msra.mxu0 %v622_v12 }
 0x14e   : > { %v620_v15 = vld [vmem:[#allocation2] sm:$0xff] }
 0x14f   : > { %v621_v13 = vld [vmem:[#allocation2 + $0x8] sm:$0xff] }
 0x150   : > { %671 = vmatprep.subr.mxu0 %v621_v13 }
 0x151   : > { %672 = vmatpush1.msra.mxu0 %v620_v15 }
 0x152   : > { %1224 = vmatmul.mubr.msk.f32.vlgmr.msra.gmra.mxu0 %vm630_vm5, %v619_v14 }
 0x153   : > { %v716_v16 = vpop.permute.xlu0 %715  ;;  %v724_v17 = vpop.permute.xlu1 %723 }
 0x157   : > { %v979_v18 = vpop.permute.xlu0 %978  ;;  %v977_v19 = vpop.permute.xlu1 %976 }
 0x158   : > { %v980_v35 = vsel %vm346_vm0, %v977_v19, %v979_v18 }
 0x15b   : > { %v947_v20 = vpop.permute.xlu0 %946  ;;  %v945_v21 = vpop.permute.xlu1 %944 }
 0x15c   : > { %v948_v38 = vsel %vm348_vm1, %v945_v21, %v947_v20 }
 0x15f   : > { %v915_v22 = vpop.permute.xlu0 %914  ;;  %v913_v23 = vpop.permute.xlu1 %912 }
 0x160   : > { %v916_v43 = vsel %vm350_vm2, %v913_v23, %v915_v22 }
 0x163   : > { %v883_v29 = vpop.permute.xlu0 %882  ;;  %v881_v30 = vpop.permute.xlu1 %880 }
 0x164   : > { %v884_v48 = vsel %vm352_vm3, %v881_v30, %v883_v29 }
 0x167   : > { %v846_v39 = vpop.permute.xlu0 %845  ;;  %v844_v40 = vpop.permute.xlu1 %843 }
 0x168   : > { %v847_v49 = vsel %vm473_vm10, %v844_v40, %v846_v39 }
 0x16b   : > { %v813_v45 = vpop.permute.xlu0 %812  ;;  %v811_v46 = vpop.permute.xlu1 %810 }
 0x16c   : > { %v814_v52 = vsel %vm441_vm11, %v811_v46, %v813_v45 }
 0x16f   : > { %v780_v3 = vpop.permute.xlu0 %779  ;;  %v778_v2 = vpop.permute.xlu1 %777 }
 0x170   : > { %v781_v55 = vsel %vm409_vm15, %v778_v2, %v780_v3 }
 0x173   : > { %v747_v56 = vpop.permute.xlu0 %746  ;;  %v745_v57 = vpop.permute.xlu1 %744 }
 0x174   : > { %v748_v60 = vsel %vm377_vm12, %v745_v57, %v747_v56 }
 0x212   : > { %v707_v24 = vpop.f32.mrf.mxu0 }
 0x213   : > { %v718_v25 = vmul.f32 %v716_v16, %v707_v24 }
 0x214   : > { %v709_v26 = vpop.f32.mrf.mxu0 }
 0x215   : > { %v726_v27 = vadd.f32 %v724_v17, %v718_v25  ;;  %v719_v28 = vmul.f32 %v716_v16, %v709_v26 }
 0x217   : > { %v1769_v31 = vmax.f32 %v726_v27, 0.0  ;;  %v727_v32 = vadd.f32 %v724_v17, %v719_v28 }
 0x219   : > { %v1771_v33 = vmax.f32 %v727_v32, 0.0  ;;  %v983_v34 = vmul.f32 %v977_v19, %v1769_v31  ;;  %v951_v41 = vmul.f32 %v945_v21, %v1769_v31  ;;  %v919_v44 = vmul.f32 %v913_v23, %v1769_v31 }
 0x21a   : > { %v887_v37 = vmul.f32 %v881_v30, %v1769_v31  ;;  %v850_v51 = vmul.f32 %v847_v49, %v1769_v31  ;;  %v817_v54 = vmul.f32 %v814_v52, %v1769_v31  ;;  %v784_v59 = vmul.f32 %v781_v55, %v1769_v31 }
 0x21b   : > { %987 = vrot.lane.b32.xlu1 %v983_v34, %s1897_s13  ;;  %v984_v36 = vmul.f32 %v980_v35, %v1771_v33  ;;  %v952_v42 = vmul.f32 %v948_v38, %v1771_v33  ;;  %v920_v47 = vmul.f32 %v916_v43, %v1771_v33  ;;  %v888_v50 = vmul.f32 %v884_v48, %v1771_v33 }
 0x21c   : > { %v851_v53 = vmul.f32 %v846_v39, %v1771_v33  ;;  %v818_v58 = vmul.f32 %v813_v45, %v1771_v33  ;;  %v785_v61 = vmul.f32 %v780_v3, %v1771_v33  ;;  %v751_v62 = vmul.f32 %v748_v60, %v1769_v31 }
 0x21d   : > { %989 = vrot.lane.b32.xlu0 %v984_v36, %s1897_s13  ;;  %v752_v63 = vmul.f32 %v747_v56, %v1771_v33 }
 0x21f   : > { %955 = vrot.lane.b32.xlu1 %v951_v41, %s1896_s24 }
 0x221   : > { %957 = vrot.lane.b32.xlu0 %v952_v42, %s1896_s24  ;;  %s1121_s24 = scalar_lea.hbm %s1876_s8, %s1239_s20 }
 0x223   : > { %923 = vrot.lane.b32.xlu1 %v919_v44, %s1895_s17 }
 0x225   : > { %925 = vrot.lane.b32.xlu0 %v920_v47, %s1895_s17 }
 0x227   : > { %891 = vrot.lane.b32.xlu1 %v887_v37, %s1440_s12 }
 0x229   : > { %893 = vrot.lane.b32.xlu0 %v888_v50, %s1440_s12  ;;  %s1446_s12 = smov [#allocation10]  }
 0x22a   : > { %s1368_s9 = sshll.u32 %s1446_s12, 4  ;;  %s1369_s9 = int_to_ptr.vmem [resolvable:$false] %s1368_s9 }
 0x22b   : > { %854 = vrot.lane.b32.xlu1 %v850_v51, %s1439_s10 }
 0x22d   : > { %856 = vrot.lane.b32.xlu0 %v851_v53, %s1439_s10 }
 0x22f   : > { %821 = vrot.lane.b32.xlu1 %v817_v54, %s1438_s26 }
 0x231   : > { %823 = vrot.lane.b32.xlu0 %v818_v58, %s1438_s26  ;;  %s1370_s26 = scalar_lea.vmem %s1369_s9, 512 }
 0x233   : > { %788 = vrot.lane.b32.xlu1 %v784_v59, %s1437_s19 }
 0x235   : > { %790 = vrot.lane.b32.xlu0 %v785_v61, %s1437_s19 }
 0x237   : > { %755 = vrot.lane.b32.xlu1 %v751_v62, %s1436_s18 }
 0x239   : > { %757 = vrot.lane.b32.xlu0 %v752_v63, %s1436_s18  ;;  %s322_s18 = sand.u32 1, %s1424_s28  }
 0x23a   : > { %s1212_s19 = sshll.u32 %s322_s18, 4  ;;  %s1109_s13 = scalar_lea.sflag [#allocation7], %s322_s18 }
 0x23b   : > { %1093 = vperm.xlu1 %1311, %v1090_v0   ;;  %s324_s22 = scalar_lea.vmem [#allocation10], %s1212_s19 }
 0x23c   : > { %s1123_s17 = sshll.u32 %s324_s22, 4  ;;  %s1124_s17 = int_to_ptr.vmem [resolvable:$true] %s1123_s17 }
 0x23d   : > { %1101 = vperm.xlu0 %1310, %v1098_v1   ;;  %s1364_s10 = scalar_lea.vmem %s1124_s17, 256  ;;  %p1371_p8 = scmp.lt.s32.totalorder %s1124_s17, %s1369_s9 }
 0x23e   : > { %p1365_p10 = scmp.ne.s32.totalorder %s1124_s17, %s1364_s10  ;;  %p1372_p11 = scmp.lt.s32.totalorder %s1370_s26, %s1364_s10 }
 0x240   : > { %p1366_p4 = pnand %p1365_p10, %p1898_p12  ;;  %p1373_p0 = por %p1372_p11, %p1371_p8 }
 0x242   : > { %p1367_p7 = pneg %p1366_p4 }
 0x244   : > { %p1374_p1 = pnand %p1373_p0, %p1367_p7 }
 0x28d   : > { %v988_v4 = vpop.permute.xlu1 %987 }
 0x28f   : > { %v990_v5 = vpop.permute.xlu0 %989 }
 0x290   : > { %v991_v6 = vsel %vm377_vm12, %v988_v4, %v990_v5  ;;  %995 = vst.msk [vmem:[#allocation3 + $0x88] sm:$0xff] %vm377_vm12, %v990_v5  ;;  %vm828_vm12 = vcmask 1047672  }
 0x291   : > { %v956_v7 = vpop.permute.xlu1 %955 }
 0x293   : > { %v958_v8 = vpop.permute.xlu0 %957 }
 0x294   : > { %v959_v9 = vsel %vm409_vm15, %v956_v7, %v958_v8  ;;  %963 = vst.msk [vmem:[#allocation3 + $0x78] sm:$0xff] %vm409_vm15, %v958_v8 }
 0x295   : > { %v924_v10 = vpop.permute.xlu1 %923 }
 0x297   : > { %v926_v11 = vpop.permute.xlu0 %925  ;;  %v1014_v12 = vld [vmem:[#allocation3 + $0x88] sm:$0xff] }
 0x298   : > { %v927_v13 = vsel %vm441_vm11, %v924_v10, %v926_v11  ;;  %931 = vst.msk [vmem:[#allocation3 + $0x68] sm:$0xff] %vm441_vm11, %v926_v11  ;;  %1033 = vmatprep.subr.mxu1 %v1014_v12  ;;  %vm795_vm11 = vcmask 1047680  }
 0x299   : > { %v892_v14 = vpop.permute.xlu1 %891  ;;  %1034 = vmatpush1.msra.mxu1 %v991_v6 }
 0x29b   : > { %v894_v15 = vpop.permute.xlu0 %893  ;;  %v1012_v16 = vld [vmem:[#allocation3 + $0x78] sm:$0xff] }
 0x29c   : > { %v895_v17 = vsel %vm473_vm10, %v892_v14, %v894_v15  ;;  %899 = vst.msk [vmem:[#allocation3 + $0x58] sm:$0xff] %vm473_vm10, %v894_v15  ;;  %1035 = vmatprep.subr.mxu1 %v1012_v16  ;;  %vm762_vm10 = vcmask 1047688  }
 0x29d   : > { %v855_v18 = vpop.permute.xlu1 %854  ;;  %1036 = vmatpush1.msra.mxu1 %v959_v9 }
 0x29e   : > { %862 = vst.msk [vmem:[#allocation3 + $0x30] sm:$0xff] %vm861_vm13, %v855_v18 }
 0x29f   : > { %v857_v19 = vpop.permute.xlu0 %856  ;;  %v1010_v20 = vld [vmem:[#allocation3 + $0x68] sm:$0xff] }
 0x2a0   : > { %v858_v21 = vsel %vm352_vm3, %v855_v18, %v857_v19  ;;  %1037 = vmatprep.subr.mxu1 %v1010_v20 }
 0x2a1   : > { %v822_v22 = vpop.permute.xlu1 %821  ;;  %1038 = vmatpush1.msra.mxu1 %v927_v13 }
 0x2a2   : > { %829 = vst.msk [vmem:[#allocation3 + $0x20] sm:$0xff] %vm828_vm12, %v822_v22 }
 0x2a3   : > { %v824_v23 = vpop.permute.xlu0 %823  ;;  %v1008_v24 = vld [vmem:[#allocation3 + $0x58] sm:$0xff] }
 0x2a4   : > { %v825_v25 = vsel %vm350_vm2, %v822_v22, %v824_v23  ;;  %1039 = vmatprep.subr.mxu1 %v1008_v24  ;;  %vm1015_vm2 = vcmask 588800  }
 0x2a5   : > { %v789_v26 = vpop.permute.xlu1 %788  ;;  %1040 = vmatpush1.msra.mxu1 %v895_v17  ;;  %v1003_v29 = vld [vmem:[#allocation3 + $0x30] sm:$0xff] }
 0x2a6   : > { %796 = vst.msk [vmem:[#allocation3 + $0x10] sm:$0xff] %vm795_vm11, %v789_v26  ;;  %1041 = vmatprep.subr.mxu1 %v1771_v33 }
 0x2a7   : > { %1042 = vmatpush1.msra.mxu1 %v1769_v31  ;;  %v791_v27 = vpop.permute.xlu0 %790  ;;  %v996_v31 = vld [vmem:[#allocation8] sm:$0xff] }
 0x2a8   : > { %v792_v28 = vsel %vm348_vm1, %v789_v26, %v791_v27  ;;  %1043 = vmatprep.subr.mxu1 %v858_v21 }
 0x2a9   : > { %v756_v30 = vpop.permute.xlu1 %755  ;;  %1044 = vmatpush1.msra.mxu1 %v1003_v29  ;;  %v1001_v32 = vld [vmem:[#allocation3 + $0x20] sm:$0xff] }
 0x2aa   : > { %763 = vst.msk [vmem:[#allocation3] sm:$0xff] %vm762_vm10, %v756_v30  ;;  %1045 = vmatprep.subr.mxu1 %v825_v25 }
 0x2ab   : > { %v758_v34 = vpop.permute.xlu0 %757  ;;  %1046 = vmatpush1.msra.mxu1 %v1001_v32 }
 0x2ac   : > { %v759_v35 = vsel %vm346_vm0, %v756_v30, %v758_v34  ;;  %1047 = vmatprep.subr.mxu1 %v792_v28 }
 0x2ad   : > { %v999_v33 = vld [vmem:[#allocation3 + $0x10] sm:$0xff] }
 0x2ae   : > { %1048 = vmatpush1.msra.mxu1 %v999_v33 }
 0x2af   : > { %1049 = vmatprep.subr.mxu1 %v759_v35 }
 0x2b1   : > { %v997_v36 = vld [vmem:[#allocation3] sm:$0xff] }
 0x2b2   : > { %1050 = vmatpush1.msra.mxu1 %v997_v36 }
 0x2b3   : > { %1232 = vmatmul.mubr.msk.f32.vlgmr.msra.gmra.mxu1 %vm1015_vm2, %v996_v31 }
 0x2b6   : > { %v1094_v38 = vpop.permute.xlu1 %1093 }
 0x2b8   : > { %v1102_v41 = vpop.permute.xlu0 %1101 }
 0x373   : > { %v1085_v39 = vpop.f32.mrf.mxu1 }
 0x374   : > { %v1096_v40 = vmul.f32 %v1094_v38, %v1085_v39 }
 0x375   : > { %v1087_v42 = vpop.f32.mrf.mxu1 }
 0x376   : > { %v1104_v43 = vadd.f32 %v1102_v41, %v1096_v40  ;;  %v1097_v44 = vmul.f32 %v1094_v38, %v1087_v42 }
 0x378   : > { %1106 = vst [vmem:[%s324_s22] sm:$0xff] %v1104_v43  ;;  %v1105_v45 = vadd.f32 %v1102_v41, %v1097_v44 }
 0x37a   : > { %1107 = vst [vmem:[%s324_s22 + $0x8] sm:$0xff] %v1105_v45 }
 0x37b   : > { %1377 = shalt.err (!%p1374_p1)
}
 0x37c   : > { %s1378_s25 = scalar_lea.hbm %s1121_s24, 256  ;;  %s1382_s20 = scalar_lea.hbm %s1876_s8, 512 }
 0x37d   : > { %p1379_p2 = scmp.ne.s32.totalorder %s1121_s24, %s1378_s25  ;;  %p1383_p9 = scmp.lt.s32.totalorder %s1121_s24, %s1876_s8 }
 0x37e   : > { %p1384_p5 = scmp.lt.s32.totalorder %s1382_s20, %s1378_s25 }
 0x37f   : > { %p1380_p3 = pnand %p1379_p2, %p1898_p12 }
 0x380   : > { %p1385_p6 = por %p1384_p5, %p1383_p9 }
 0x381   : > { %p1381_p13 = pneg %p1380_p3 }
 0x383   : > { %p1386_p10 = pnand %p1385_p6, %p1381_p13 }
 0x385   : > { %1389 = shalt.err (!%p1386_p10)
}
 0x386   : > { %1248 = dma.vmem_to_hbm [thread:$0]  (%p1898_p12), %s1124_s17, 256, %s1121_s24, %s1109_s13  }
 0x387 PF: > { %p1265_p4 = scmp.ge.s32.totalorder %s1432_s30, 2  ;;  %s1135_s23 = sand.u32 1, %s1420_s27  }
 0x388   : > { %p1899_p7 = scmp.ne.s32.totalorder %s1887_s16, 0  ;;  %s1136_s10 = scalar_lea.sflag [#allocation7], %s1135_s23 }
 0x38a   : > { %p1258_p8 = pnand %p1265_p4, %p1899_p7 }
 0x38c   : > { %p1259_p11 = pneg %p1258_p8 }
 0x38e   : > { %1415 = dma.done.wait (%p1259_p11), %s1136_s10, 256  }
 0x38f   : > { %1417 = vsyncadd (%p1259_p11), %s1136_s10, 4294967040  ;;  %p20_p0 = scmp.ge.s32.totalorder %s1517_s11, 4   ;;  %s1900_s27 = smov %s1424_s28 }
 0x390   : > { %s1901_s28 = smov %s1428_s29  ;;  %s1902_s29 = smov %s1528_s14 }
 0x391   : > { %s1903_s30 = smov %s1517_s11  ;;  %22 = sbr.rel (!%p20_p0) target bundleno = 5 (0x5), region = 103 }
 0x396   :  { %1141 = vsyncpa [#allocation6], 1 }
 0x397   :  { %1143 = vsyncpa [#allocation6 + $0x1], 1 }
 0x398   :  { %1144 = vsyncpa [#allocation9], 1 }
 0x399   :  { %1145 = vsyncpa [#allocation7], 1 }
 0x39a   :  { %1147 = vsyncpa [#allocation7 + $0x1], 1 }

</bundles_post_ra>
